<compile_context>
chip_gen: v5e
topology: v5e:2x2
jax: 0.10.0
libtpu: 0.0.40
codegen_flags: <defaults>
</compile_context>

<pallas_src>
import functools

import jax
import jax.numpy as jnp
from jax.experimental import pallas as pl
from jax.experimental.pallas import tpu as pltpu

BN_EPS = 1e-5
OUT_PAD = 128      # lane-dense padded width of the final projection
NEG_PAD = -1e9     # b3 pad value: padded logits are argmax/softmax-safe


# --------------------------------------------------------------------------
# Kernel
# --------------------------------------------------------------------------
def _mlp_kernel(x_ref, w1_ref, b1_ref, w2_ref, b2_ref, w3_ref, b3_ref, out_ref):
    """Fused 3-layer MLP (BN folded into the linears, dropout = identity).

    Matmuls run in bf16 on the MXU with f32 accumulation; bias-add and ReLU
    stay f32 on the VPU.  The f32->bf16 input cast happens here so the
    wrapper never writes a bf16 copy of the input back to HBM.
    """
    x = x_ref[...].astype(jnp.bfloat16)                           # (TB, 784)

    # layer 1: Linear(784 -> 512) with BN1 folded in; ReLU fused with downcast
    h = jnp.dot(x, w1_ref[...], preferred_element_type=jnp.float32) + b1_ref[...]
    h = jnp.maximum(h, 0.0).astype(jnp.bfloat16)
    # TODO(synk): training-mode Dropout(p=0.2) is stochastic; eval semantics
    # (identity) are implemented here.

    # layer 2: Linear(512 -> 256) with BN2 folded in
    h = jnp.dot(h, w2_ref[...], preferred_element_type=jnp.float32) + b2_ref[...]
    h = jnp.maximum(h, 0.0).astype(jnp.bfloat16)

    # layer 3: Linear(256 -> num_classes), padded to 128 lanes (unmasked vst)
    out = jnp.dot(h, w3_ref[...], preferred_element_type=jnp.float32) + b3_ref[...]
    out_ref[...] = out.astype(out_ref.dtype)                      # (TB, 128) f32


# --------------------------------------------------------------------------
# Wrapper
# --------------------------------------------------------------------------
def _batch_tile(B):
    """Multiple-of-8 batch tile targeting >=4 grid steps, capped at 512.

    >=4 steps lets the pipeliner hide input DMA / output writeback under
    compute and gives v7x megacore >=2 steps per TensorCore; the 512 cap
    keeps the per-step VMEM footprint inside every generation's default
    scoped-VMEM limit (v6e could go to 1024 with vmem_limit_bytes raised).
    """
    tb = -(-B // 4)                  # cdiv(B, 4)
    tb = ((tb + 7) // 8) * 8         # round up to a sublane multiple
    return max(8, min(512, tb))


@functools.partial(jax.jit, static_argnames=("num_classes", "return_padded"))
def classification_net_forward(x, packed, num_classes=10, return_padded=False):
    """x: (B, C, H, W) with C*H*W == 784.

    return_padded=False -> (B, num_classes) logits (module-exact shape).
    return_padded=True  -> (B, 128) slab; columns >= num_classes hold -1e9,
    so softmax/argmax consumers can use it directly and skip the slice pass.
    """
    B = x.shape[0]
    x_flat = x.reshape(B, -1)        # nn.Flatten: free metadata op, stays f32
    K = x_flat.shape[1]

    TB = _batch_tile(B)
    grid = (pl.cdiv(B, TB),)

    w1, b1 = packed["w1"], packed["b1"]
    w2, b2 = packed["w2"], packed["b2"]
    w3, b3 = packed["w3"], packed["b3"]

    def const(i):  # weights/biases: same block every step -> stay VMEM-resident
        return (0, 0)

    out = pl.pallas_call(
        _mlp_kernel,
        out_shape=jax.ShapeDtypeStruct((B, OUT_PAD), jnp.float32),
        grid=grid,
        in_specs=[
            pl.BlockSpec((TB, K), lambda i: (i, 0)),   # batched f32 input tile
            pl.BlockSpec(w1.shape, const),
            pl.BlockSpec(b1.shape, const),
            pl.BlockSpec(w2.shape, const),
            pl.BlockSpec(b2.shape, const),
            pl.BlockSpec(w3.shape, const),
            pl.BlockSpec(b3.shape, const),
        ],
        out_specs=pl.BlockSpec((TB, OUT_PAD), lambda i: (i, 0)),
        compiler_params=pltpu.CompilerParams(
            dimension_semantics=("parallel",)),        # megacore sharding on v7x
    )(x_flat, w1, b1, w2, b2, w3, b3)

    if return_padded:
        return out
    return out[:, :num_classes]


# --------------------------------------------------------------------------
# Parameter preparation (done once, offline)
# --------------------------------------------------------------------------
def fold_and_pack_params(params, num_classes=10):
    """Fold eval-mode BN into the linears, cast weights to bf16, pad the
    final projection to a lane-dense 128-wide slab (bias pad = -1e9)."""
    def fold(w, b, g, beta, m, v):
        scale = g * jax.lax.rsqrt(v + BN_EPS)            # (1, D)
        w_f = (w * scale).astype(jnp.bfloat16)           # scale output columns
        b_f = ((b - m) * scale + beta).astype(jnp.float32)
        return w_f, b_f

    w1, b1 = fold(params["w1"], params["b1"], params["bn1_g"], params["bn1_b"],
                  params["bn1_m"], params["bn1_v"])
    w2, b2 = fold(params["w2"], params["b2"], params["bn2_g"], params["bn2_b"],
                  params["bn2_m"], params["bn2_v"])

    pad = OUT_PAD - num_classes
    w3 = jnp.pad(params["w3"], ((0, 0), (0, pad))).astype(jnp.bfloat16)
    b3 = jnp.pad(params["b3"], ((0, 0), (0, pad)),
                 constant_values=NEG_PAD).astype(jnp.float32)

    return {"w1": w1, "b1": b1, "w2": w2, "b2": b2, "w3": w3, "b3": b3}


def init_params(key, num_classes=10):
    """Deterministic synthetic parameters matching the PyTorch module shapes."""
    ks = jax.random.split(key, 8)

    def linear(kw, kb, fan_in, fan_out):
        bound = 1.0 / jnp.sqrt(fan_in)
        w = jax.random.uniform(kw, (fan_in, fan_out), jnp.float32, -bound, bound)
        b = jax.random.uniform(kb, (1, fan_out), jnp.float32, -bound, bound)
        return w, b

    w1, b1 = linear(ks[0], ks[1], 784, 512)
    w2, b2 = linear(ks[2], ks[3], 512, 256)
    w3, b3 = linear(ks[4], ks[5], 256, num_classes)

    # BatchNorm1d defaults (weight=1, bias=0, var=1), perturbed running mean
    # so BN actually transforms.
    bn1_m = 0.1 * jax.random.normal(ks[6], (1, 512), jnp.float32)
    bn2_m = 0.1 * jax.random.normal(ks[7], (1, 256), jnp.float32)

    return {
        "w1": w1, "b1": b1,
        "bn1_g": jnp.ones((1, 512), jnp.float32),
        "bn1_b": jnp.zeros((1, 512), jnp.float32),
        "bn1_m": bn1_m,
        "bn1_v": jnp.ones((1, 512), jnp.float32),
        "w2": w2, "b2": b2,
        "bn2_g": jnp.ones((1, 256), jnp.float32),
        "bn2_b": jnp.zeros((1, 256), jnp.float32),
        "bn2_m": bn2_m,
        "bn2_v": jnp.ones((1, 256), jnp.float32),
        "w3": w3, "b3": b3,
    }


# --------------------------------------------------------------------------
# References
# --------------------------------------------------------------------------
def _reference_same_math(x, packed, num_classes=10):
    """Pure-JAX reference using the exact folded bf16 params / f32 accumulate."""
    h = x.reshape(x.shape[0], -1).astype(jnp.bfloat16)
    h = jnp.dot(h, packed["w1"], preferred_element_type=jnp.float32) + packed["b1"]
    h = jnp.maximum(h, 0.0).astype(jnp.bfloat16)
    h = jnp.dot(h, packed["w2"], preferred_element_type=jnp.float32) + packed["b2"]
    h = jnp.maximum(h, 0.0).astype(jnp.bfloat16)
    out = jnp.dot(h, packed["w3"], preferred_element_type=jnp.float32) + packed["b3"]
    return out[:, :num_classes]


def _reference_f32(x, params):
    """Full-precision reference of the original (unfolded) module math."""
    h = x.reshape(x.shape[0], -1).astype(jnp.float32)
    h = h @ params["w1"] + params["b1"]
    h = (h - params["bn1_m"]) / jnp.sqrt(params["bn1_v"] + BN_EPS)
    h = h * params["bn1_g"] + params["bn1_b"]
    h = jnp.maximum(h, 0.0)
    h = h @ params["w2"] + params["b2"]
    h = (h - params["bn2_m"]) / jnp.sqrt(params["bn2_v"] + BN_EPS)
    h = h * params["bn2_g"] + params["bn2_b"]
    h = jnp.maximum(h, 0.0)
    return h @ params["w3"] + params["b3"]


if __name__ == "__main__":
    key = jax.random.PRNGKey(0)
    k_x, k_p = jax.random.split(key)

    # Batch 32 -> TB=8, grid=(4,): exercises pipelining and megacore sharding.
    # Spatial shape 1x28x28 so flatten gives the 784 features nn.Linear(784,.)
    # requires (the 3x64x64 tensor in the PyTorch file would not type-check).
    B, C, H, W = 32, 1, 28, 28
    x = jax.random.normal(k_x, (B, C, H, W), jnp.float32)

    raw_params = init_params(k_p, num_classes=10)
    packed = fold_and_pack_params(raw_params, num_classes=10)

    logits = classification_net_forward(x, packed, num_classes=10)
    logits = jax.block_until_ready(logits)
    assert logits.shape == (B, 10)

    # padded-slab path (no slice pass); its first 10 columns must match.
    padded = classification_net_forward(x, packed, num_classes=10,
                                        return_padded=True)
    padded = jax.block_until_ready(padded)
    assert padded.shape == (B, OUT_PAD)
    assert jnp.allclose(padded[:, :10], logits)

    # 1) exact-math parity against a JAX reference with identical folded
    #    bf16 params and f32 accumulation.
    ref_bf16 = _reference_same_math(x, packed, num_classes=10)
    assert jnp.allclose(logits, ref_bf16, atol=1e-2, rtol=1e-2)

    # 2) semantic parity against the original f32 Linear+BN+ReLU math
    #    (loose tolerance accounts only for the bf16 weight/activation cast).
    ref_f32 = _reference_f32(x, raw_params)
    assert jnp.allclose(logits, ref_f32, atol=1e-1, rtol=1e-1)

    print("KERNEL_OK")
</pallas_src>

<mosaic_0001>
module attributes {stable_mosaic.version = 11 : i64} {
  func.func @_mlp_kernel(%arg0: i32, %arg1: memref<8x784xf32, #tpu.memory_space<vmem>>, %arg2: memref<784x512xbf16, #tpu.memory_space<vmem>>, %arg3: memref<1x512xf32, #tpu.memory_space<vmem>>, %arg4: memref<512x256xbf16, #tpu.memory_space<vmem>>, %arg5: memref<1x256xf32, #tpu.memory_space<vmem>>, %arg6: memref<256x128xbf16, #tpu.memory_space<vmem>>, %arg7: memref<1x128xf32, #tpu.memory_space<vmem>>, %arg8: memref<8x128xf32, #tpu.memory_space<vmem>>) attributes {dimension_semantics = [#tpu.dimension_semantics<parallel>], iteration_bounds = array<i64: 4>, scalar_prefetch = 0 : i64, scratch_operands = 0 : i64, tpu.core_type = #tpu.core_type<tc>, window_params = [{transform_indices = @transform_0, window_bounds = array<i64: 8, 784>}, {pipeline_mode = #tpu.pipeline_mode<synchronous>, transform_indices = @transform_1, window_bounds = array<i64: 784, 512>}, {pipeline_mode = #tpu.pipeline_mode<synchronous>, transform_indices = @transform_2, window_bounds = array<i64: 1, 512>}, {pipeline_mode = #tpu.pipeline_mode<synchronous>, transform_indices = @transform_3, window_bounds = array<i64: 512, 256>}, {pipeline_mode = #tpu.pipeline_mode<synchronous>, transform_indices = @transform_4, window_bounds = array<i64: 1, 256>}, {pipeline_mode = #tpu.pipeline_mode<synchronous>, transform_indices = @transform_5, window_bounds = array<i64: 256, 128>}, {pipeline_mode = #tpu.pipeline_mode<synchronous>, transform_indices = @transform_6, window_bounds = array<i64: 1, 128>}, {transform_indices = @transform_7, window_bounds = array<i64: 8, 128>}]} {
    %c0 = arith.constant 0 : index
    %c0_0 = arith.constant 0 : index
    %0 = vector.load %arg1[%c0, %c0_0] : memref<8x784xf32, #tpu.memory_space<vmem>>, vector<8x784xf32>
    %1 = arith.truncf %0 : vector<8x784xf32> to vector<8x784xbf16>
    %c0_1 = arith.constant 0 : index
    %c0_2 = arith.constant 0 : index
    %2 = vector.load %arg2[%c0_1, %c0_2] : memref<784x512xbf16, #tpu.memory_space<vmem>>, vector<784x512xbf16>
    %cst = arith.constant dense<0.000000e+00> : vector<8x512xf32>
    %3 = tpu.matmul %1, %2, %cst {dimension_numbers = #tpu.dot_dimension_numbers<[1], [0], [0], [1], [0, 0, 1, 1], [], []>} : vector<8x784xbf16>, vector<784x512xbf16>, vector<8x512xf32> -> vector<8x512xf32>
    %c0_3 = arith.constant 0 : index
    %c0_4 = arith.constant 0 : index
    %4 = vector.load %arg3[%c0_3, %c0_4] : memref<1x512xf32, #tpu.memory_space<vmem>>, vector<1x512xf32>
    %5 = vector.broadcast %4 : vector<1x512xf32> to vector<8x512xf32>
    %6 = arith.addf %3, %5 : vector<8x512xf32>
    %cst_5 = arith.constant 0.000000e+00 : f32
    %7 = vector.broadcast %cst_5 : f32 to vector<8x512xf32>
    %8 = arith.maximumf %6, %7 : vector<8x512xf32>
    %9 = arith.truncf %8 : vector<8x512xf32> to vector<8x512xbf16>
    %c0_6 = arith.constant 0 : index
    %c0_7 = arith.constant 0 : index
    %10 = vector.load %arg4[%c0_6, %c0_7] : memref<512x256xbf16, #tpu.memory_space<vmem>>, vector<512x256xbf16>
    %cst_8 = arith.constant dense<0.000000e+00> : vector<8x256xf32>
    %11 = tpu.matmul %9, %10, %cst_8 {dimension_numbers = #tpu.dot_dimension_numbers<[1], [0], [0], [1], [0, 0, 1, 1], [], []>} : vector<8x512xbf16>, vector<512x256xbf16>, vector<8x256xf32> -> vector<8x256xf32>
    %c0_9 = arith.constant 0 : index
    %c0_10 = arith.constant 0 : index
    %12 = vector.load %arg5[%c0_9, %c0_10] : memref<1x256xf32, #tpu.memory_space<vmem>>, vector<1x256xf32>
    %13 = vector.broadcast %12 : vector<1x256xf32> to vector<8x256xf32>
    %14 = arith.addf %11, %13 : vector<8x256xf32>
    %cst_11 = arith.constant 0.000000e+00 : f32
    %15 = vector.broadcast %cst_11 : f32 to vector<8x256xf32>
    %16 = arith.maximumf %14, %15 : vector<8x256xf32>
    %17 = arith.truncf %16 : vector<8x256xf32> to vector<8x256xbf16>
    %c0_12 = arith.constant 0 : index
    %c0_13 = arith.constant 0 : index
    %18 = vector.load %arg6[%c0_12, %c0_13] : memref<256x128xbf16, #tpu.memory_space<vmem>>, vector<256x128xbf16>
    %cst_14 = arith.constant dense<0.000000e+00> : vector<8x128xf32>
    %19 = tpu.matmul %17, %18, %cst_14 {dimension_numbers = #tpu.dot_dimension_numbers<[1], [0], [0], [1], [0, 0, 1, 1], [], []>} : vector<8x256xbf16>, vector<256x128xbf16>, vector<8x128xf32> -> vector<8x128xf32>
    %c0_15 = arith.constant 0 : index
    %c0_16 = arith.constant 0 : index
    %20 = vector.load %arg7[%c0_15, %c0_16] : memref<1x128xf32, #tpu.memory_space<vmem>>, vector<1x128xf32>
    %21 = vector.broadcast %20 : vector<1x128xf32> to vector<8x128xf32>
    %22 = arith.addf %19, %21 : vector<8x128xf32>
    %c0_17 = arith.constant 0 : index
    %c0_18 = arith.constant 0 : index
    %23 = vector.load %arg8[%c0_17, %c0_18] : memref<8x128xf32, #tpu.memory_space<vmem>>, vector<8x128xf32>
    tpu.vector_store %arg8[%c0_17, %c0_18], %22 {strides = array<i32>} : memref<8x128xf32, #tpu.memory_space<vmem>>, vector<8x128xf32>,
    return
  }
  func.func @transform_0(%arg0: i32) -> (i32, i32) {
    %c0_i32 = arith.constant 0 : i32
    %c0_i32_0 = arith.constant 0 : i32
    return %arg0, %c0_i32 : i32, i32
  }
  func.func @transform_1(%arg0: i32) -> (i32, i32) {
    %c0_i32 = arith.constant 0 : i32
    %c0_i32_0 = arith.constant 0 : i32
    %c0_i32_1 = arith.constant 0 : i32
    return %c0_i32, %c0_i32_0 : i32, i32
  }
  func.func @transform_2(%arg0: i32) -> (i32, i32) {
    %c0_i32 = arith.constant 0 : i32
    %c0_i32_0 = arith.constant 0 : i32
    %c0_i32_1 = arith.constant 0 : i32
    return %c0_i32, %c0_i32_0 : i32, i32
  }
  func.func @transform_3(%arg0: i32) -> (i32, i32) {
    %c0_i32 = arith.constant 0 : i32
    %c0_i32_0 = arith.constant 0 : i32
    %c0_i32_1 = arith.constant 0 : i32
    return %c0_i32, %c0_i32_0 : i32, i32
  }
  func.func @transform_4(%arg0: i32) -> (i32, i32) {
    %c0_i32 = arith.constant 0 : i32
    %c0_i32_0 = arith.constant 0 : i32
    %c0_i32_1 = arith.constant 0 : i32
    return %c0_i32, %c0_i32_0 : i32, i32
  }
  func.func @transform_5(%arg0: i32) -> (i32, i32) {
    %c0_i32 = arith.constant 0 : i32
    %c0_i32_0 = arith.constant 0 : i32
    %c0_i32_1 = arith.constant 0 : i32
    return %c0_i32, %c0_i32_0 : i32, i32
  }
  func.func @transform_6(%arg0: i32) -> (i32, i32) {
    %c0_i32 = arith.constant 0 : i32
    %c0_i32_0 = arith.constant 0 : i32
    %c0_i32_1 = arith.constant 0 : i32
    return %c0_i32, %c0_i32_0 : i32, i32
  }
  func.func @transform_7(%arg0: i32) -> (i32, i32) {
    %c0_i32 = arith.constant 0 : i32
    %c0_i32_0 = arith.constant 0 : i32
    return %arg0, %c0_i32 : i32, i32
  }
}

</mosaic_0001>

<bundles_post_ra>
// kernel: classification_net_forward.1
= control target key start
LH: loop header
LB: loop body
LE: loop exit
PB: predicated region body
PF: predicated region fallthrough
CT: control target
= control target key end

     0   :  { %12 = vsyncpa [#allocation3], 0  ;;  %s4096_s24 = smov 0   ;;  %s4645_s0 = inlined_call_operand.vmem [shape: f32[32,784], index: 0, kind: input, shape index: {}]   ;;  %s4646_s1 = inlined_call_operand.hbm [shape: bf16[784,512], index: 1, kind: input, shape index: {}]   ;;  %s4647_s2 = inlined_call_operand.vmem [shape: f32[1,512], index: 2, kind: input, shape index: {}]   ;;  %s4648_s3 = inlined_call_operand.vmem [shape: bf16[512,256], index: 3, kind: input, shape index: {}]   ;;  %s4649_s4 = inlined_call_operand.vmem [shape: f32[1,256], index: 4, kind: input, shape index: {}]   ;;  %s4650_s5 = inlined_call_operand.vmem [shape: bf16[256,128], index: 5, kind: input, shape index: {}]   ;;  %s4651_s6 = inlined_call_operand.vmem [shape: f32[1,128], index: 6, kind: input, shape index: {}]   ;;  %s4652_s7 = inlined_call_operand.vmem [shape: f32[32,128], index: 7, kind: output, shape index: {}]  }
   0x1 LB: > { %s212_s27 = sshll.u32 %s4646_s1, 4  ;;  %s4105_s28 = sadd.s32 4294967295, %s4051_s24   ;;  %s4051_s24 = sphi %s4096_s24, %s18_s24   ;;  %s213_s27 = int_to_ptr.hbm [resolvable:$true] %s212_s27 }
   0x2   : > { %p2595_p0 = scmp.ge.s32.totalorder %s4051_s24, 1  ;;  %p201_p1 = scmp.lt.s32.totalorder %s4051_s24, 5 }
   0x3   : > { %p3997_p2 = scmp.eq.s32.totalorder %s4105_s28, 0  ;;  %s4053_s29 = smov [#allocation2]  }
   0x4   : > { %p202_p3 = pnand %p2595_p0, %p201_p1  ;;  %s214_s30 = sshll.u32 %s4053_s29, 4  ;;  %s215_s30 = int_to_ptr.vmem [resolvable:$true] %s214_s30 }
   0x5   : > { %s4054_s8 = smov 256   ;;  %s4055_s9 = smov 16  }
   0x6   : > { %p3993_p4 = pneg %p202_p3  ;;  %253 = sbr.rel (%p202_p3) target bundleno = 650 (0x28a), region = 48 }
   0x8   : > { %p3994_p5 = pnand %p3997_p2, %p3993_p4 }
   0xa   : > { %3996 = dma.hbm_to_vmem [thread:$0]  (!%p3994_p5), %s213_s27, 25088, %s215_s30, [#allocation3], %s4054_s8, %s4054_s8, %s4055_s9  }
   0xb   : > { %4046 = dma.done.wait (%p3997_p2), [#allocation3], 25088  }
   0xc   : > { %4048 = vsyncadd (%p3997_p2), [#allocation3], 4294942208  ;;  %v2716_v0 = vld [vmem:[#allocation2 + $0xe0] sm:$0xf]  ;;  %v3742_v1 = vld [vmem:[#allocation2 + $0xec] sm:$0xf0] }
   0xd   : > { %v2844_v2 = vld [vmem:[#allocation2 + $0x1e0] sm:$0xf]  ;;  %v2717_v3 = vor.u32 %v3742_v1, %v2716_v0  ;;  %v3774_v4 = vld [vmem:[#allocation2 + $0x1ec] sm:$0xf0]  ;;  %p285_p6 = scmp.lt.s32.totalorder %s4105_s28, 3  ;;  %vm1495_vm0 = vcmask 130048  }
   0xe   : > { %v2972_v5 = vld [vmem:[#allocation2 + $0x2e0] sm:$0xf]  ;;  %v3806_v6 = vld [vmem:[#allocation2 + $0x2ec] sm:$0xf0]  ;;  %v2845_v7 = vor.u32 %v3774_v4, %v2844_v2 }
   0xf   : > { %v2973_v8 = vor.u32 %v3806_v6, %v2972_v5  ;;  %v3100_v9 = vld [vmem:[#allocation2 + $0x3e0] sm:$0xf]  ;;  %v3838_v10 = vld [vmem:[#allocation2 + $0x3ec] sm:$0xf0]  ;;  %1499 = vmatpush.bf16.msra.mxu0 %v2717_v3  ;;  %s4654_s28 = smov (!%p285_p6, %s4105_s28), 3 }
  0x10   : > { %v2700_v11 = vld [vmem:[#allocation2 + $0xc0] sm:$0xf]  ;;  %v3101_v12 = vor.u32 %v3838_v10, %v3100_v9  ;;  %v3738_v13 = vld [vmem:[#allocation2 + $0xcc] sm:$0xf0]  ;;  %1512 = vmatpush.bf16.msra.mxu1 %v2845_v7  ;;  %s3988_s10 = smul.u32 56, %s4654_s28  ;;  %s2601_s14 = sshll.u32 %s4654_s28, 3 }
  0x11   : > { %v2828_v14 = vld [vmem:[#allocation2 + $0x1c0] sm:$0xf]  ;;  %v3770_v15 = vld [vmem:[#allocation2 + $0x1cc] sm:$0xf0]  ;;  %1525 = vmatpush.bf16.msra.mxu2 %v2973_v8  ;;  %v2701_v16 = vor.u32 %v3738_v13, %v2700_v11  ;;  %s293_s17 = scalar_lea.vmem %s4652_s7, %s2601_s14 }
  0x12   : > { %v2829_v17 = vor.u32 %v3770_v15, %v2828_v14  ;;  %v2956_v18 = vld [vmem:[#allocation2 + $0x2c0] sm:$0xf]  ;;  %v3802_v19 = vld [vmem:[#allocation2 + $0x2cc] sm:$0xf0]  ;;  %1538 = vmatpush.bf16.msra.mxu3 %v3101_v12  ;;  %s4120_s13 = scalar_lea.vmem %s4645_s0, %s3988_s10 }
  0x13   : > { %v3084_v20 = vld [vmem:[#allocation2 + $0x3c0] sm:$0xf]  ;;  %v2957_v21 = vor.u32 %v3802_v19, %v2956_v18  ;;  %v3834_v22 = vld [vmem:[#allocation2 + $0x3cc] sm:$0xf0]  ;;  %1500 = vmatpush.bf16.msra.mxu0 %v2701_v16 }
  0x14   : > { %v2684_v23 = vld [vmem:[#allocation2 + $0xa0] sm:$0xf]  ;;  %v3734_v24 = vld [vmem:[#allocation2 + $0xac] sm:$0xf0]  ;;  %v3085_v25 = vor.u32 %v3834_v22, %v3084_v20  ;;  %1513 = vmatpush.bf16.msra.mxu1 %v2829_v17 }
  0x15   : > { %v2812_v26 = vld [vmem:[#allocation2 + $0x1a0] sm:$0xf]  ;;  %v3766_v27 = vld [vmem:[#allocation2 + $0x1ac] sm:$0xf0]  ;;  %v2685_v29 = vor.u32 %v3734_v24, %v2684_v23  ;;  %1526 = vmatpush.bf16.msra.mxu2 %v2957_v21 }
  0x16   : > { %v2940_v28 = vld [vmem:[#allocation2 + $0x2a0] sm:$0xf]  ;;  %v3798_v30 = vld [vmem:[#allocation2 + $0x2ac] sm:$0xf0]  ;;  %v2813_v33 = vor.u32 %v3766_v27, %v2812_v26  ;;  %1539 = vmatpush.bf16.msra.mxu3 %v3085_v25 }
  0x17   : > { %v3068_v31 = vld [vmem:[#allocation2 + $0x3a0] sm:$0xf]  ;;  %v3830_v32 = vld [vmem:[#allocation2 + $0x3ac] sm:$0xf0]  ;;  %v2941_v34 = vor.u32 %v3798_v30, %v2940_v28  ;;  %1501 = vmatpush.bf16.msra.mxu0 %v2685_v29 }
  0x18   : > { %v2668_v35 = vld [vmem:[#allocation2 + $0x80] sm:$0xf]  ;;  %v3730_v36 = vld [vmem:[#allocation2 + $0x8c] sm:$0xf0]  ;;  %v3069_v38 = vor.u32 %v3830_v32, %v3068_v31  ;;  %1514 = vmatpush.bf16.msra.mxu1 %v2813_v33  ;;  %v3740_v33 = vld [vmem:[#allocation2 + $0xe4] sm:$0xf] }
  0x19   : > { %v2796_v37 = vld [vmem:[#allocation2 + $0x180] sm:$0xf]  ;;  %v3762_v39 = vld [vmem:[#allocation2 + $0x18c] sm:$0xf0]  ;;  %v2669_v44 = vor.u32 %v3730_v36, %v2668_v35  ;;  %1527 = vmatpush.bf16.msra.mxu2 %v2941_v34  ;;  %v2718_v34 = vld [vmem:[#allocation2 + $0xf0] sm:$0xf0] }
  0x1a   : > { %v2924_v40 = vld [vmem:[#allocation2 + $0x280] sm:$0xf]  ;;  %v3794_v41 = vld [vmem:[#allocation2 + $0x28c] sm:$0xf0]  ;;  %v2797_v45 = vor.u32 %v3762_v39, %v2796_v37  ;;  %1540 = vmatpush.bf16.msra.mxu3 %v3069_v38 }
  0x1b   : > { %v3052_v42 = vld [vmem:[#allocation2 + $0x380] sm:$0xf]  ;;  %v3826_v43 = vld [vmem:[#allocation2 + $0x38c] sm:$0xf0]  ;;  %v2925_v46 = vor.u32 %v3794_v41, %v2924_v40  ;;  %1502 = vmatpush.bf16.msra.mxu0 %v2669_v44  ;;  %v2846_v44 = vld [vmem:[#allocation2 + $0x1f0] sm:$0xf0] }
  0x1c   : > { %v2652_v47 = vld [vmem:[#allocation2 + $0x60] sm:$0xf]  ;;  %v3726_v48 = vld [vmem:[#allocation2 + $0x6c] sm:$0xf0]  ;;  %v3053_v50 = vor.u32 %v3826_v43, %v3052_v42  ;;  %1515 = vmatpush.bf16.msra.mxu1 %v2797_v45  ;;  %v3772_v43 = vld [vmem:[#allocation2 + $0x1e4] sm:$0xf] }
  0x1d   : > { %v2780_v49 = vld [vmem:[#allocation2 + $0x160] sm:$0xf]  ;;  %v3758_v51 = vld [vmem:[#allocation2 + $0x16c] sm:$0xf0]  ;;  %v2653_v56 = vor.u32 %v3726_v48, %v2652_v47  ;;  %1528 = vmatpush.bf16.msra.mxu2 %v2925_v46  ;;  %v298_v45 = vld [vmem:[%s4120_s13 + $0x18] sm:$0xff]  ;;  %v2721_v47 = vor.u32 %v3740_v33, %v2718_v34 }
  0x1e   : > { %v2908_v52 = vld [vmem:[#allocation2 + $0x260] sm:$0xf]  ;;  %v3790_v53 = vld [vmem:[#allocation2 + $0x26c] sm:$0xf0]  ;;  %v2781_v57 = vor.u32 %v3758_v51, %v2780_v49  ;;  %1541 = vmatpush.bf16.msra.mxu3 %v3053_v50 }
  0x1f   : > { %v3036_v54 = vld [vmem:[#allocation2 + $0x360] sm:$0xf]  ;;  %v3822_v55 = vld [vmem:[#allocation2 + $0x36c] sm:$0xf0]  ;;  %v2909_v58 = vor.u32 %v3790_v53, %v2908_v52  ;;  %1503 = vmatpush.bf16.msra.mxu0 %v2653_v56  ;;  %v3736_v53 = vld [vmem:[#allocation2 + $0xc4] sm:$0xf] }
  0x20   : > { %v2636_v59 = vld [vmem:[#allocation2 + $0x40] sm:$0xf]  ;;  %v3722_v60 = vld [vmem:[#allocation2 + $0x4c] sm:$0xf0]  ;;  %v3037_v62 = vor.u32 %v3822_v55, %v3036_v54  ;;  %1516 = vmatpush.bf16.msra.mxu1 %v2781_v57  ;;  %v2702_v54 = vld [vmem:[#allocation2 + $0xd0] sm:$0xf0]  ;;  %v4129_v57 = vpack.c.bf16 %v298_v45, %v298_v45 }
  0x21   : > { %v2764_v61 = vld [vmem:[#allocation2 + $0x140] sm:$0xf]  ;;  %v3754_v63 = vld [vmem:[#allocation2 + $0x14c] sm:$0xf0]  ;;  %v2637_v4 = vor.u32 %v3722_v60, %v2636_v59  ;;  %1529 = vmatpush.bf16.msra.mxu2 %v2909_v58  ;;  %v296_v58 = vld [vmem:[%s4120_s13 + $0x8] sm:$0xff]  ;;  %v2849_v59 = vor.u32 %v3772_v43, %v2846_v44 }
  0x22   : > { %v2892_v0 = vld [vmem:[#allocation2 + $0x240] sm:$0xf]  ;;  %v3786_v1 = vld [vmem:[#allocation2 + $0x24c] sm:$0xf0]  ;;  %v2765_v5 = vor.u32 %v3754_v63, %v2764_v61  ;;  %1542 = vmatpush.bf16.msra.mxu3 %v3037_v62  ;;  %v3768_v61 = vld [vmem:[#allocation2 + $0x1c4] sm:$0xf] }
  0x23   : > { %v3020_v2 = vld [vmem:[#allocation2 + $0x340] sm:$0xf]  ;;  %v3818_v3 = vld [vmem:[#allocation2 + $0x34c] sm:$0xf0]  ;;  %v2893_v6 = vor.u32 %v3786_v1, %v2892_v0  ;;  %1504 = vmatpush.bf16.msra.mxu0 %v2637_v4  ;;  %v2830_v62 = vld [vmem:[#allocation2 + $0x1d0] sm:$0xf0]  ;;  %v2705_v0 = vor.u32 %v3736_v53, %v2702_v54  ;;  %v4134_v4 = vpack.c.bf16 %v296_v58, %v296_v58 }
  0x24   : > { %v2620_v7 = vld [vmem:[#allocation2 + $0x20] sm:$0xf]  ;;  %v3718_v8 = vld [vmem:[#allocation2 + $0x2c] sm:$0xf0]  ;;  %v3021_v10 = vor.u32 %v3818_v3, %v3020_v2  ;;  %1517 = vmatpush.bf16.msra.mxu1 %v2765_v5  ;;  %v3720_v43 = vld [vmem:[#allocation2 + $0x44] sm:$0xf] }
  0x25   : > { %v2748_v9 = vld [vmem:[#allocation2 + $0x120] sm:$0xf]  ;;  %v3750_v11 = vld [vmem:[#allocation2 + $0x12c] sm:$0xf0]  ;;  %v2621_v16 = vor.u32 %v3718_v8, %v2620_v7  ;;  %1530 = vmatpush.bf16.msra.mxu2 %v2893_v6  ;;  %v3732_v6 = vld [vmem:[#allocation2 + $0xa4] sm:$0xf]  ;;  %v2833_v8 = vor.u32 %v3768_v61, %v2830_v62 }
  0x26   : > { %v2876_v12 = vld [vmem:[#allocation2 + $0x220] sm:$0xf]  ;;  %v3782_v13 = vld [vmem:[#allocation2 + $0x22c] sm:$0xf0]  ;;  %v2749_v20 = vor.u32 %v3750_v11, %v2748_v9  ;;  %1543 = vmatpush.bf16.msra.mxu3 %v3021_v10  ;;  %v2686_v7 = vld [vmem:[#allocation2 + $0xb0] sm:$0xf0] }
  0x27   : > { %v3004_v14 = vld [vmem:[#allocation2 + $0x320] sm:$0xf]  ;;  %v3814_v15 = vld [vmem:[#allocation2 + $0x32c] sm:$0xf0]  ;;  %v2877_v21 = vor.u32 %v3782_v13, %v2876_v12  ;;  %1505 = vmatpush.bf16.msra.mxu0 %v2621_v16  ;;  %v3764_v10 = vld [vmem:[#allocation2 + $0x1a4] sm:$0xf]  ;;  %v2689_v13 = vor.u32 %v3732_v6, %v2686_v7 }
  0x28   : > { %v2604_v17 = vld [vmem:[#allocation2] sm:$0xf]  ;;  %v3714_v18 = vld [vmem:[#allocation2 + $0xc] sm:$0xf0]  ;;  %v3005_v25 = vor.u32 %v3814_v15, %v3004_v14  ;;  %1518 = vmatpush.bf16.msra.mxu1 %v2749_v20  ;;  %v2814_v11 = vld [vmem:[#allocation2 + $0x1b0] sm:$0xf0] }
  0x29   : > { %v2732_v19 = vld [vmem:[#allocation2 + $0x100] sm:$0xf]  ;;  %v3746_v22 = vld [vmem:[#allocation2 + $0x10c] sm:$0xf0]  ;;  %v2605_v32 = vor.u32 %v3714_v18, %v2604_v17  ;;  %1531 = vmatpush.bf16.msra.mxu2 %v2877_v21  ;;  %v3728_v18 = vld [vmem:[#allocation2 + $0x84] sm:$0xf]  ;;  %v2817_v20 = vor.u32 %v3764_v10, %v2814_v11 }
  0x2a   : > { %v2860_v23 = vld [vmem:[#allocation2 + $0x200] sm:$0xf]  ;;  %v3778_v24 = vld [vmem:[#allocation2 + $0x20c] sm:$0xf0]  ;;  %v2733_v36 = vor.u32 %v3746_v22, %v2732_v19  ;;  %1544 = vmatpush.bf16.msra.mxu3 %v3005_v25  ;;  %v2670_v19 = vld [vmem:[#allocation2 + $0x90] sm:$0xf0] }
  0x2b   : > { %v2988_v26 = vld [vmem:[#allocation2 + $0x300] sm:$0xf]  ;;  %v3810_v27 = vld [vmem:[#allocation2 + $0x30c] sm:$0xf0]  ;;  %v2861_v37 = vor.u32 %v3778_v24, %v2860_v23  ;;  %1506 = vmatpush.bf16.msra.mxu0 %v2605_v32  ;;  %v3760_v22 = vld [vmem:[#allocation2 + $0x184] sm:$0xf]  ;;  %v2673_v25 = vor.u32 %v3728_v18, %v2670_v19 }
  0x2c   : > { %v3228_v28 = vld [vmem:[#allocation2 + $0x4e0] sm:$0xf]  ;;  %v3870_v29 = vld [vmem:[#allocation2 + $0x4ec] sm:$0xf0]  ;;  %v2989_v41 = vor.u32 %v3810_v27, %v2988_v26  ;;  %1519 = vmatpush.bf16.msra.mxu1 %v2733_v36  ;;  %v2798_v23 = vld [vmem:[#allocation2 + $0x190] sm:$0xf0] }
  0x2d   : > { %v3356_v30 = vld [vmem:[#allocation2 + $0x5e0] sm:$0xf]  ;;  %v3902_v31 = vld [vmem:[#allocation2 + $0x5ec] sm:$0xf0]  ;;  %v3229_v42 = vor.u32 %v3870_v29, %v3228_v28  ;;  %1532 = vmatpush.bf16.msra.mxu2 %v2861_v37  ;;  %v2801_v33 = vor.u32 %v3760_v22, %v2798_v23  ;;  %v2782_v36 = vld [vmem:[#allocation2 + $0x170] sm:$0xf0] }
  0x2e   : > { %v297_v35 = vld [vmem:[%s4120_s13 + $0x10] sm:$0xff]  ;;  %v3372_v38 = vld [vmem:[#allocation2 + $0x600] sm:$0xf]  ;;  %v3357_v46 = vor.u32 %v3902_v31, %v3356_v30  ;;  %1545 = vmatpush.bf16.msra.mxu3 %v2989_v41  ;;  %v3724_v30 = vld [vmem:[#allocation2 + $0x64] sm:$0xf] }
  0x2f   : > { %v3906_v39 = vld [vmem:[#allocation2 + $0x60c] sm:$0xf0]  ;;  %v295_v40 = vld [vmem:[%s4120_s13] sm:$0xff]  ;;  %v4125_v51 = vpack.c.bf16 %v297_v35, %v297_v35  ;;  %1551 = vmatpush.bf16.msrb.mxu0 %v3229_v42  ;;  %1520 = vmatmul.bf16.vlgmr.msra.gmra.mxu1 %v4134_v4  ;;  %v2654_v31 = vld [vmem:[#allocation2 + $0x70] sm:$0xf0] }
  0x30   : > { %v3212_v48 = vld [vmem:[#allocation2 + $0x4c0] sm:$0xf]  ;;  %v3866_v49 = vld [vmem:[#allocation2 + $0x4cc] sm:$0xf0]  ;;  %v4127_v55 = vpack.c.bf16 %v295_v40, %v295_v40  ;;  %v3373_v56 = vor.u32 %v3906_v39, %v3372_v38  ;;  %1564 = vmatpush.bf16.msrb.mxu1 %v3357_v46  ;;  %v3756_v35 = vld [vmem:[#allocation2 + $0x164] sm:$0xf]  ;;  %v2657_v38 = vor.u32 %v3724_v30, %v2654_v31 }
  0x31   : > { %v3340_v50 = vld [vmem:[#allocation2 + $0x5c0] sm:$0xf]  ;;  %v3898_v52 = vld [vmem:[#allocation2 + $0x5cc] sm:$0xf0]  ;;  %v3213_v60 = vor.u32 %v3866_v49, %v3212_v48  ;;  %1533 = vmatmul.bf16.vlgmr.msra.gmra.mxu2 %v4125_v51  ;;  %1546 = vmatmul.bf16.vlgmr.msra.gmra.mxu3 %v4129_v57  ;;  %v2638_v44 = vld [vmem:[#allocation2 + $0x50] sm:$0xf0]  ;;  %v2785_v46 = vor.u32 %v3756_v35, %v2782_v36 }
  0x32   : > { %1590 = vmatpush.bf16.msrb.mxu3 %v2721_v47  ;;  %v3341_v63 = vor.u32 %v3898_v52, %v3340_v50  ;;  %v3196_v1 = vld [vmem:[#allocation2 + $0x4a0] sm:$0xf]  ;;  %v3862_v2 = vld [vmem:[#allocation2 + $0x4ac] sm:$0xf0]  ;;  %1507 = vmatmul.bf16.vlgmr.msra.gmra.mxu0 %v4127_v55  ;;  %v3752_v48 = vld [vmem:[#allocation2 + $0x144] sm:$0xf]  ;;  %v2641_v52 = vor.u32 %v3720_v43, %v2638_v44 }
  0x33   : > { %v3324_v3 = vld [vmem:[#allocation2 + $0x5a0] sm:$0xf]  ;;  %v3894_v5 = vld [vmem:[#allocation2 + $0x5ac] sm:$0xf0]  ;;  %1584 = vmatpush.bf16.msrb.mxu2 %v3373_v56  ;;  %1552 = vmatpush.bf16.msrb.mxu0 %v3213_v60  ;;  %v3197_v9 = vor.u32 %v3862_v2, %v3196_v1  ;;  %v2766_v49 = vld [vmem:[#allocation2 + $0x150] sm:$0xf0] }
  0x34   : > { %1565 = vmatpush.bf16.msrb.mxu1 %v3341_v63  ;;  %v3325_v12 = vor.u32 %v3894_v5, %v3324_v3  ;;  %v3180_v14 = vld [vmem:[#allocation2 + $0x480] sm:$0xf]  ;;  %v3858_v15 = vld [vmem:[#allocation2 + $0x48c] sm:$0xf0]  ;;  %v2622_v60 = vld [vmem:[#allocation2 + $0x30] sm:$0xf0]  ;;  %v2769_v61 = vor.u32 %v3752_v48, %v2766_v49 }
  0x35   : > { %v3308_v16 = vld [vmem:[#allocation2 + $0x580] sm:$0xf]  ;;  %v3890_v17 = vld [vmem:[#allocation2 + $0x58c] sm:$0xf0]  ;;  %v3181_v21 = vor.u32 %v3858_v15, %v3180_v14  ;;  %v3748_v63 = vld [vmem:[#allocation2 + $0x124] sm:$0xf] }
  0x36   : > { %1591 = vmatpush.bf16.msrb.mxu3 %v2705_v0  ;;  %v3309_v24 = vor.u32 %v3890_v17, %v3308_v16  ;;  %v3164_v26 = vld [vmem:[#allocation2 + $0x460] sm:$0xf]  ;;  %v3854_v27 = vld [vmem:[#allocation2 + $0x46c] sm:$0xf0]  ;;  %v2750_v0 = vld [vmem:[#allocation2 + $0x130] sm:$0xf0] }
  0x37   : > { %1603 = vmatpush.bf16.msra.mxu2 %v2849_v59  ;;  %1553 = vmatpush.bf16.msrb.mxu0 %v3197_v9  ;;  %v3292_v28 = vld [vmem:[#allocation2 + $0x560] sm:$0xf]  ;;  %v3886_v29 = vld [vmem:[#allocation2 + $0x56c] sm:$0xf0]  ;;  %v3165_v34 = vor.u32 %v3854_v27, %v3164_v26  ;;  %v3716_v59 = vld [vmem:[#allocation2 + $0x24] sm:$0xf]  ;;  %v2753_v14 = vor.u32 %v3748_v63, %v2750_v0 }
  0x38   : > { %1566 = vmatpush.bf16.msrb.mxu1 %v3325_v12  ;;  %v301_v32 = vld [vmem:[%s4120_s13 + $0x30] sm:$0xff]  ;;  %v3293_v37 = vor.u32 %v3886_v29, %v3292_v28  ;;  %v3148_v39 = vld [vmem:[#allocation2 + $0x440] sm:$0xf]  ;;  %v2625_v3 = vor.u32 %v3716_v59, %v2622_v60  ;;  %v3804_v10 = vld [vmem:[#allocation2 + $0x2e4] sm:$0xf] }
  0x39   : > { %v3850_v40 = vld [vmem:[#allocation2 + $0x44c] sm:$0xf0]  ;;  %v3276_v41 = vld [vmem:[#allocation2 + $0x540] sm:$0xf]  ;;  %v4139_v45 = vpack.c.bf16 %v301_v32, %v301_v32  ;;  %v2606_v9 = vld [vmem:[#allocation2 + $0x10] sm:$0xf0] }
  0x3a   : > { %1592 = vmatpush.bf16.msrb.mxu3 %v2689_v13  ;;  %v3882_v42 = vld [vmem:[#allocation2 + $0x54c] sm:$0xf0]  ;;  %v3149_v47 = vor.u32 %v3850_v40, %v3148_v39  ;;  %v3132_v53 = vld [vmem:[#allocation2 + $0x420] sm:$0xf]  ;;  %v2974_v11 = vld [vmem:[#allocation2 + $0x2f0] sm:$0xf0] }
  0x3b   : > { %1604 = vmatpush.bf16.msra.mxu2 %v2833_v8  ;;  %1554 = vmatpush.bf16.msrb.mxu0 %v3181_v21  ;;  %v3277_v50 = vor.u32 %v3882_v42, %v3276_v41  ;;  %v3846_v54 = vld [vmem:[#allocation2 + $0x42c] sm:$0xf0]  ;;  %v3260_v56 = vld [vmem:[#allocation2 + $0x520] sm:$0xf]  ;;  %v3712_v8 = vld [vmem:[#allocation2 + $0x4] sm:$0xf] }
  0x3c   : > { %1567 = vmatpush.bf16.msrb.mxu1 %v3309_v24  ;;  %v3878_v58 = vld [vmem:[#allocation2 + $0x52c] sm:$0xf0]  ;;  %v3133_v62 = vor.u32 %v3846_v54, %v3132_v53  ;;  %v3116_v1 = vld [vmem:[#allocation2 + $0x400] sm:$0xf]  ;;  %v3836_v12 = vld [vmem:[#allocation2 + $0x3e4] sm:$0xf]  ;;  %v2977_v24 = vor.u32 %v3804_v10, %v2974_v11 }
  0x3d   : > { %v3261_v2 = vor.u32 %v3878_v58, %v3260_v56  ;;  %v3842_v5 = vld [vmem:[#allocation2 + $0x40c] sm:$0xf0]  ;;  %v3244_v6 = vld [vmem:[#allocation2 + $0x500] sm:$0xf]  ;;  %v3102_v13 = vld [vmem:[#allocation2 + $0x3f0] sm:$0xf0] }
  0x3e   : > { %1593 = vmatpush.bf16.msrb.mxu3 %v2673_v25  ;;  %v3874_v7 = vld [vmem:[#allocation2 + $0x50c] sm:$0xf0]  ;;  %v3117_v15 = vor.u32 %v3842_v5, %v3116_v1  ;;  %v3868_v16 = vld [vmem:[#allocation2 + $0x4e4] sm:$0xf]  ;;  %v3230_v17 = vld [vmem:[#allocation2 + $0x4f0] sm:$0xf0]  ;;  %v3105_v25 = vor.u32 %v3836_v12, %v3102_v13 }
  0x3f   : > { %1605 = vmatpush.bf16.msra.mxu2 %v2817_v20  ;;  %1555 = vmatpush.bf16.msrb.mxu0 %v3165_v34  ;;  %v299_v18 = vld [vmem:[%s4120_s13 + $0x20] sm:$0xff]  ;;  %v3245_v19 = vor.u32 %v3874_v7, %v3244_v6  ;;  %v2609_v20 = vor.u32 %v3712_v8, %v2606_v9  ;;  %v2734_v22 = vld [vmem:[#allocation2 + $0x110] sm:$0xf0]  ;;  %v300_v23 = vld [vmem:[%s4120_s13 + $0x28] sm:$0xff]  ;;  %v3233_v29 = vor.u32 %v3868_v16, %v3230_v17 }
  0x40   : > { %1568 = vmatpush.bf16.msrb.mxu1 %v3293_v37  ;;  %v3744_v21 = vld [vmem:[#allocation2 + $0x104] sm:$0xf]  ;;  %v3358_v27 = vld [vmem:[#allocation2 + $0x5f0] sm:$0xf0]  ;;  %v4145_v30 = vpack.c.bf16 %v299_v18, %v299_v18  ;;  %v4147_v35 = vpack.c.bf16 %v300_v23, %v300_v23 }
  0x41   : > { %3386 = vmatmul.msk.bf16.vlgmr.msrb.gmra.mxu2 %vm1495_vm0, %v4139_v45  ;;  %v3900_v26 = vld [vmem:[#allocation2 + $0x5e4] sm:$0xf]  ;;  %v2958_v31 = vld [vmem:[#allocation2 + $0x2d0] sm:$0xf0]  ;;  %v2737_v34 = vor.u32 %v3744_v21, %v2734_v22 }
  0x42   : > { %1594 = vmatpush.bf16.msrb.mxu3 %v2657_v38  ;;  %v3800_v28 = vld [vmem:[#allocation2 + $0x2c4] sm:$0xf]  ;;  %v3214_v37 = vld [vmem:[#allocation2 + $0x4d0] sm:$0xf0]  ;;  %v3361_v38 = vor.u32 %v3900_v26, %v3358_v27 }
  0x43   : > { %1606 = vmatpush.bf16.msra.mxu2 %v2801_v33  ;;  %1556 = vmatpush.bf16.msrb.mxu0 %v3149_v47  ;;  %v3832_v32 = vld [vmem:[#allocation2 + $0x3c4] sm:$0xf]  ;;  %v3086_v33 = vld [vmem:[#allocation2 + $0x3d0] sm:$0xf0]  ;;  %v2961_v39 = vor.u32 %v3800_v28, %v2958_v31 }
  0x44   : > { %1569 = vmatpush.bf16.msrb.mxu1 %v3277_v50  ;;  %v3864_v36 = vld [vmem:[#allocation2 + $0x4c4] sm:$0xf]  ;;  %v3089_v40 = vor.u32 %v3832_v32, %v3086_v33  ;;  %v3342_v42 = vld [vmem:[#allocation2 + $0x5d0] sm:$0xf0] }
  0x45   : > { %v3896_v41 = vld [vmem:[#allocation2 + $0x5c4] sm:$0xf]  ;;  %v3217_v44 = vor.u32 %v3864_v36, %v3214_v37  ;;  %v3070_v48 = vld [vmem:[#allocation2 + $0x3b0] sm:$0xf0] }
  0x46   : > { %1595 = vmatpush.bf16.msrb.mxu3 %v2641_v52  ;;  %v3796_v43 = vld [vmem:[#allocation2 + $0x2a4] sm:$0xf]  ;;  %v3198_v50 = vld [vmem:[#allocation2 + $0x4b0] sm:$0xf0]  ;;  %v3345_v52 = vor.u32 %v3896_v41, %v3342_v42 }
  0x47   : > { %1607 = vmatpush.bf16.msra.mxu2 %v2785_v46  ;;  %1557 = vmatpush.bf16.msrb.mxu0 %v3133_v62  ;;  %v2942_v46 = vld [vmem:[#allocation2 + $0x2b0] sm:$0xf0]  ;;  %v3828_v47 = vld [vmem:[#allocation2 + $0x3a4] sm:$0xf] }
  0x48   : > { %1570 = vmatpush.bf16.msrb.mxu1 %v3261_v2  ;;  %v3860_v49 = vld [vmem:[#allocation2 + $0x4a4] sm:$0xf]  ;;  %v2945_v53 = vor.u32 %v3796_v43, %v2942_v46  ;;  %v3073_v54 = vor.u32 %v3828_v47, %v3070_v48  ;;  %v3326_v58 = vld [vmem:[#allocation2 + $0x5b0] sm:$0xf0] }
  0x49   : > { %v3892_v56 = vld [vmem:[#allocation2 + $0x5a4] sm:$0xf]  ;;  %v3201_v60 = vor.u32 %v3860_v49, %v3198_v50  ;;  %v3054_v63 = vld [vmem:[#allocation2 + $0x390] sm:$0xf0] }
  0x4a   : > { %1596 = vmatpush.bf16.msrb.mxu3 %v2625_v3  ;;  %v3792_v59 = vld [vmem:[#allocation2 + $0x284] sm:$0xf]  ;;  %v3182_v1 = vld [vmem:[#allocation2 + $0x490] sm:$0xf0]  ;;  %v3329_v2 = vor.u32 %v3892_v56, %v3326_v58  ;;  %v2724_v56 = vld [vmem:[#allocation2 + $0xe8] sm:$0xf] }
  0x4b   : > { %1608 = vmatpush.bf16.msra.mxu2 %v2769_v61  ;;  %1558 = vmatpush.bf16.msrb.mxu0 %v3117_v15  ;;  %v2926_v61 = vld [vmem:[#allocation2 + $0x290] sm:$0xf0]  ;;  %v3824_v62 = vld [vmem:[#allocation2 + $0x384] sm:$0xf]  ;;  %v3743_v58 = vld [vmem:[#allocation2 + $0xf4] sm:$0xf0] }
  0x4c   : > { %1571 = vmatpush.bf16.msrb.mxu1 %v3245_v19  ;;  %v3856_v0 = vld [vmem:[#allocation2 + $0x484] sm:$0xf]  ;;  %v2929_v3 = vor.u32 %v3792_v59, %v2926_v61  ;;  %v3057_v5 = vor.u32 %v3824_v62, %v3054_v63  ;;  %v3310_v7 = vld [vmem:[#allocation2 + $0x590] sm:$0xf0]  ;;  %v2852_v59 = vld [vmem:[#allocation2 + $0x1e8] sm:$0xf] }
  0x4d   : > { %v3888_v6 = vld [vmem:[#allocation2 + $0x584] sm:$0xf]  ;;  %v3185_v9 = vor.u32 %v3856_v0, %v3182_v1  ;;  %v2910_v10 = vld [vmem:[#allocation2 + $0x270] sm:$0xf0]  ;;  %v3775_v61 = vld [vmem:[#allocation2 + $0x1f4] sm:$0xf0] }
  0x4e   : > { %1597 = vmatpush.bf16.msrb.mxu3 %v2609_v20  ;;  %1559 = vmatmul.bf16.vlgmr.msrb.gmra.mxu0 %v4145_v30  ;;  %v3788_v8 = vld [vmem:[#allocation2 + $0x264] sm:$0xf]  ;;  %v3038_v12 = vld [vmem:[#allocation2 + $0x370] sm:$0xf0]  ;;  %v3313_v15 = vor.u32 %v3888_v6, %v3310_v7  ;;  %v2725_v6 = vor.u32 %v3743_v58, %v2724_v56  ;;  %v3108_v7 = vld [vmem:[#allocation2 + $0x3e8] sm:$0xf] }
  0x4f   : > { %1609 = vmatpush.bf16.msra.mxu2 %v2753_v14  ;;  %1616 = vmatpush.bf16.msra.mxu0 %v2977_v24  ;;  %v3820_v11 = vld [vmem:[#allocation2 + $0x364] sm:$0xf]  ;;  %v3166_v14 = vld [vmem:[#allocation2 + $0x470] sm:$0xf0]  ;;  %v2913_v16 = vor.u32 %v3788_v8, %v2910_v10  ;;  %v3839_v8 = vld [vmem:[#allocation2 + $0x3f4] sm:$0xf0]  ;;  %v2853_v10 = vor.u32 %v3775_v61, %v2852_v59 }
  0x50   : > { %1629 = vmatpush.bf16.msra.mxu1 %v3105_v25  ;;  %v3852_v13 = vld [vmem:[#allocation2 + $0x464] sm:$0xf]  ;;  %v3041_v17 = vor.u32 %v3820_v11, %v3038_v12  ;;  %v3294_v19 = vld [vmem:[#allocation2 + $0x570] sm:$0xf0]  ;;  %v3739_v11 = vld [vmem:[#allocation2 + $0xd4] sm:$0xf0] }
  0x51   : > { %1572 = vmatmul.bf16.vlgmr.msrb.gmra.mxu1 %v4147_v35  ;;  %1598 = vmatmul.bf16.vlgmr.msrb.gmra.mxu3 %v4127_v55  ;;  %v3884_v18 = vld [vmem:[#allocation2 + $0x564] sm:$0xf]  ;;  %v3169_v21 = vor.u32 %v3852_v13, %v3166_v14  ;;  %v2894_v22 = vld [vmem:[#allocation2 + $0x250] sm:$0xf0]  ;;  %v2980_v13 = vld [vmem:[#allocation2 + $0x2e8] sm:$0xf] }
  0x52   : > { %1642 = vmatpush.bf16.msra.mxu3 %v3233_v29  ;;  %v3784_v20 = vld [vmem:[#allocation2 + $0x244] sm:$0xf]  ;;  %v3022_v24 = vld [vmem:[#allocation2 + $0x350] sm:$0xf0]  ;;  %v3297_v27 = vor.u32 %v3884_v18, %v3294_v19  ;;  %v3807_v14 = vld [vmem:[#allocation2 + $0x2f4] sm:$0xf0]  ;;  %v3109_v18 = vor.u32 %v3839_v8, %v3108_v7 }
  0x53   : > { %1610 = vmatpush.bf16.msra.mxu2 %v2737_v34  ;;  %1617 = vmatpush.bf16.msra.mxu0 %v2961_v39  ;;  %v3816_v23 = vld [vmem:[#allocation2 + $0x344] sm:$0xf]  ;;  %v3150_v26 = vld [vmem:[#allocation2 + $0x450] sm:$0xf0]  ;;  %v2897_v28 = vor.u32 %v3784_v20, %v2894_v22  ;;  %v3092_v20 = vld [vmem:[#allocation2 + $0x3c8] sm:$0xf] }
  0x54   : > { %1630 = vmatpush.bf16.msra.mxu1 %v3089_v40  ;;  %v3848_v25 = vld [vmem:[#allocation2 + $0x444] sm:$0xf]  ;;  %v3025_v29 = vor.u32 %v3816_v23, %v3022_v24  ;;  %v3278_v32 = vld [vmem:[#allocation2 + $0x550] sm:$0xf0]  ;;  %v2692_v22 = vld [vmem:[#allocation2 + $0xa8] sm:$0xf]  ;;  %v2981_v23 = vor.u32 %v3807_v14, %v2980_v13 }
  0x55   : > { %v3880_v31 = vld [vmem:[#allocation2 + $0x544] sm:$0xf]  ;;  %v3153_v34 = vor.u32 %v3848_v25, %v3150_v26  ;;  %v2878_v36 = vld [vmem:[#allocation2 + $0x230] sm:$0xf0]  ;;  %v3735_v25 = vld [vmem:[#allocation2 + $0xb4] sm:$0xf0] }
  0x56   : > { %1643 = vmatpush.bf16.msra.mxu3 %v3217_v44  ;;  %1611 = vmatmul.bf16.vlgmr.msra.gmra.mxu2 %v4134_v4  ;;  %v3780_v33 = vld [vmem:[#allocation2 + $0x224] sm:$0xf]  ;;  %v3134_v40 = vld [vmem:[#allocation2 + $0x430] sm:$0xf0]  ;;  %v3281_v41 = vor.u32 %v3880_v31, %v3278_v32  ;;  %v2964_v26 = vld [vmem:[#allocation2 + $0x2c8] sm:$0xf]  ;;  %v2693_v32 = vor.u32 %v3735_v25, %v2692_v22 }
  0x57   : > { %1655 = vmatpush.bf16.msrb.mxu2 %v3361_v38  ;;  %1618 = vmatpush.bf16.msra.mxu0 %v2945_v53  ;;  %v3812_v37 = vld [vmem:[#allocation2 + $0x324] sm:$0xf]  ;;  %v3006_v38 = vld [vmem:[#allocation2 + $0x330] sm:$0xf0]  ;;  %v2881_v46 = vor.u32 %v3780_v33, %v2878_v36  ;;  %v3076_v33 = vld [vmem:[#allocation2 + $0x3a8] sm:$0xf] }
  0x58   : > { %1631 = vmatpush.bf16.msra.mxu1 %v3073_v54  ;;  %v3844_v39 = vld [vmem:[#allocation2 + $0x424] sm:$0xf]  ;;  %v3262_v43 = vld [vmem:[#allocation2 + $0x530] sm:$0xf0]  ;;  %v3009_v47 = vor.u32 %v3812_v37, %v3006_v38  ;;  %v2676_v36 = vld [vmem:[#allocation2 + $0x88] sm:$0xf] }
  0x59   : > { %v3876_v42 = vld [vmem:[#allocation2 + $0x524] sm:$0xf]  ;;  %v2862_v48 = vld [vmem:[#allocation2 + $0x210] sm:$0xf0]  ;;  %v3795_v56 = vld [vmem:[#allocation2 + $0x294] sm:$0xf0] }
  0x5a   : > { %1644 = vmatpush.bf16.msra.mxu3 %v3201_v60  ;;  %v3776_v44 = vld [vmem:[#allocation2 + $0x204] sm:$0xf]  ;;  %v2990_v50 = vld [vmem:[#allocation2 + $0x310] sm:$0xf0]  ;;  %v3265_v60 = vor.u32 %v3876_v42, %v3262_v43  ;;  %v2804_v42 = vld [vmem:[#allocation2 + $0x188] sm:$0xf] }
  0x5b   : > { %1656 = vmatpush.bf16.msrb.mxu2 %v3345_v52  ;;  %1619 = vmatpush.bf16.msra.mxu0 %v2929_v3  ;;  %v3808_v49 = vld [vmem:[#allocation2 + $0x304] sm:$0xf]  ;;  %v3137_v52 = vor.u32 %v3844_v39, %v3134_v40  ;;  %v3118_v54 = vld [vmem:[#allocation2 + $0x410] sm:$0xf0]  ;;  %v2865_v0 = vor.u32 %v3776_v44, %v2862_v48  ;;  %v3731_v39 = vld [vmem:[#allocation2 + $0x94] sm:$0xf0] }
  0x5c   : > { %1632 = vmatpush.bf16.msra.mxu1 %v3057_v5  ;;  %v3840_v53 = vld [vmem:[#allocation2 + $0x404] sm:$0xf]  ;;  %v3374_v63 = vld [vmem:[#allocation2 + $0x610] sm:$0xf0]  ;;  %v2993_v1 = vor.u32 %v3808_v49, %v2990_v50  ;;  %v2948_v40 = vld [vmem:[#allocation2 + $0x2a8] sm:$0xf] }
  0x5d   : > { %v3904_v62 = vld [vmem:[#allocation2 + $0x604] sm:$0xf]  ;;  %v3246_v3 = vld [vmem:[#allocation2 + $0x510] sm:$0xf0]  ;;  %v3121_v5 = vor.u32 %v3840_v53, %v3118_v54  ;;  %v3763_v43 = vld [vmem:[#allocation2 + $0x194] sm:$0xf0] }
  0x5e   : > { %1645 = vmatpush.bf16.msra.mxu3 %v3185_v9  ;;  %v2708_v9 = vld [vmem:[#allocation2 + $0xc8] sm:$0xf]  ;;  %v3377_v12 = vor.u32 %v3904_v62, %v3374_v63  ;;  %v3827_v48 = vld [vmem:[#allocation2 + $0x394] sm:$0xf0] }
  0x5f   : > { %1657 = vmatpush.bf16.msrb.mxu2 %v3329_v2  ;;  %1620 = vmatpush.bf16.msra.mxu0 %v2913_v16  ;;  %v3872_v2 = vld [vmem:[#allocation2 + $0x504] sm:$0xf]  ;;  %v2836_v16 = vld [vmem:[#allocation2 + $0x1c8] sm:$0xf]  ;;  %v2709_v19 = vor.u32 %v3739_v11, %v2708_v9  ;;  %v3727_v53 = vld [vmem:[#allocation2 + $0x74] sm:$0xf0] }
  0x60   : > { %1633 = vmatpush.bf16.msra.mxu1 %v3041_v17  ;;  %v3771_v17 = vld [vmem:[#allocation2 + $0x1d4] sm:$0xf0]  ;;  %v2660_v49 = vld [vmem:[#allocation2 + $0x68] sm:$0xf] }
  0x61   : > { %v2837_v24 = vor.u32 %v3771_v17, %v2836_v16  ;;  %v2932_v54 = vld [vmem:[#allocation2 + $0x288] sm:$0xf]  ;;  %v3759_v59 = vld [vmem:[#allocation2 + $0x174] sm:$0xf0]  ;;  %v2661_v61 = vor.u32 %v3727_v53, %v2660_v49 }
  0x62   : > { %1646 = vmatpush.bf16.msra.mxu3 %v3169_v21  ;;  %v3835_v21 = vld [vmem:[#allocation2 + $0x3d4] sm:$0xf0]  ;;  %v2788_v58 = vld [vmem:[#allocation2 + $0x168] sm:$0xf] }
  0x63   : > { %1658 = vmatpush.bf16.msrb.mxu2 %v3313_v15  ;;  %1621 = vmatpush.bf16.msra.mxu0 %v2897_v28  ;;  %v3249_v15 = vor.u32 %v3872_v2, %v3246_v3  ;;  %v2820_v28 = vld [vmem:[#allocation2 + $0x1a8] sm:$0xf]  ;;  %v3093_v31 = vor.u32 %v3835_v21, %v3092_v20  ;;  %v3823_v63 = vld [vmem:[#allocation2 + $0x374] sm:$0xf0]  ;;  %v2789_v2 = vor.u32 %v3759_v59, %v2788_v58 }
  0x64   : > { %1634 = vmatpush.bf16.msra.mxu1 %v3025_v29  ;;  %v3767_v29 = vld [vmem:[#allocation2 + $0x1b4] sm:$0xf0]  ;;  %v3044_v62 = vld [vmem:[#allocation2 + $0x368] sm:$0xf] }
  0x65   : > { %v2821_v38 = vor.u32 %v3767_v29, %v2820_v28  ;;  %v3723_v3 = vld [vmem:[#allocation2 + $0x54] sm:$0xf0]  ;;  %v2772_v7 = vld [vmem:[#allocation2 + $0x148] sm:$0xf]  ;;  %v3045_v9 = vor.u32 %v3823_v63, %v3044_v62 }
  0x66   : > { %1647 = vmatpush.bf16.msra.mxu3 %v3153_v34  ;;  %v3831_v34 = vld [vmem:[#allocation2 + $0x3b4] sm:$0xf0]  ;;  %v3028_v11 = vld [vmem:[#allocation2 + $0x348] sm:$0xf] }
  0x67   : > { %1659 = vmatpush.bf16.msrb.mxu2 %v3297_v27  ;;  %1622 = vmatpush.bf16.msra.mxu0 %v2881_v46  ;;  %v3803_v27 = vld [vmem:[#allocation2 + $0x2d4] sm:$0xf0]  ;;  %v3077_v44 = vor.u32 %v3831_v34, %v3076_v33  ;;  %v2677_v46 = vor.u32 %v3731_v39, %v2676_v36  ;;  %v2628_v13 = vld [vmem:[#allocation2 + $0x28] sm:$0xf] }
  0x68   : > { %1635 = vmatpush.bf16.msra.mxu1 %v3009_v47  ;;  %v2965_v37 = vor.u32 %v3803_v27, %v2964_v26  ;;  %v3060_v47 = vld [vmem:[#allocation2 + $0x388] sm:$0xf]  ;;  %v3755_v8 = vld [vmem:[#allocation2 + $0x154] sm:$0xf0] }
  0x69   : > { %v3719_v16 = vld [vmem:[#allocation2 + $0x34] sm:$0xf0]  ;;  %v2900_v17 = vld [vmem:[#allocation2 + $0x248] sm:$0xf] }
  0x6a   : > { %1648 = vmatpush.bf16.msra.mxu3 %v3137_v52  ;;  %v2805_v52 = vor.u32 %v3763_v43, %v2804_v42  ;;  %v3751_v20 = vld [vmem:[#allocation2 + $0x134] sm:$0xf0]  ;;  %v3012_v22 = vld [vmem:[#allocation2 + $0x328] sm:$0xf] }
  0x6b   : > { %1660 = vmatpush.bf16.msrb.mxu2 %v3281_v41  ;;  %1623 = vmatpush.bf16.msra.mxu0 %v2865_v0  ;;  %v3799_v41 = vld [vmem:[#allocation2 + $0x2b4] sm:$0xf0]  ;;  %v2644_v0 = vld [vmem:[#allocation2 + $0x48] sm:$0xf] }
  0x6c   : > { %1636 = vmatpush.bf16.msra.mxu1 %v2993_v1  ;;  %v2949_v50 = vor.u32 %v3799_v41, %v2948_v40  ;;  %v2933_v1 = vor.u32 %v3795_v56, %v2932_v54  ;;  %v2612_v25 = vld [vmem:[#allocation2 + $0x8] sm:$0xf]  ;;  %v3715_v26 = vld [vmem:[#allocation2 + $0x14] sm:$0xf0] }
  0x6d   : > { %v2740_v29 = vld [vmem:[#allocation2 + $0x108] sm:$0xf]  ;;  %v3747_v33 = vld [vmem:[#allocation2 + $0x114] sm:$0xf0]  ;;  %v2613_v41 = vor.u32 %v3715_v26, %v2612_v25  ;;  %v3729_v25 = vld [vmem:[#allocation2 + $0x8c] sm:$0xf] }
  0x6e   : > { %1649 = vmatpush.bf16.msra.mxu3 %v3121_v5  ;;  %1624 = vmatmul.bf16.vlgmr.msra.gmra.mxu0 %v4125_v51  ;;  %v2916_v5 = vld [vmem:[#allocation2 + $0x268] sm:$0xf]  ;;  %v3871_v36 = vld [vmem:[#allocation2 + $0x4f4] sm:$0xf0] }
  0x6f   : > { %1661 = vmatpush.bf16.msrb.mxu2 %v3265_v60  ;;  %1675 = vmatpush.bf16.msrb.mxu0 %v3377_v12  ;;  %v3061_v60 = vor.u32 %v3827_v48, %v3060_v47  ;;  %v3819_v12 = vld [vmem:[#allocation2 + $0x354] sm:$0xf0]  ;;  %v3236_v34 = vld [vmem:[#allocation2 + $0x4e8] sm:$0xf]  ;;  %v2741_v47 = vor.u32 %v3747_v33, %v2740_v29  ;;  %v3765_v29 = vld [vmem:[#allocation2 + $0x1ac] sm:$0xf] }
  0x70   : > { %1681 = vmatpush.bf16.msrb.mxu1 %v2725_v6  ;;  %v3791_v6 = vld [vmem:[#allocation2 + $0x274] sm:$0xf0]  ;;  %v3029_v21 = vor.u32 %v3819_v12, %v3028_v11  ;;  %v2996_v40 = vld [vmem:[#allocation2 + $0x308] sm:$0xf]  ;;  %v3237_v48 = vor.u32 %v3871_v36, %v3236_v34 }
  0x71   : > { %1650 = vmatmul.bf16.vlgmr.msra.gmra.mxu3 %v4145_v30  ;;  %1637 = vmatmul.bf16.vlgmr.msra.gmra.mxu1 %v4129_v57  ;;  %v2917_v14 = vor.u32 %v3791_v6, %v2916_v5  ;;  %v3903_v39 = vld [vmem:[#allocation2 + $0x5f4] sm:$0xf0]  ;;  %v3220_v49 = vld [vmem:[#allocation2 + $0x4c8] sm:$0xf]  ;;  %v3773_v5 = vld [vmem:[#allocation2 + $0x1ec] sm:$0xf] }
  0x72   : > { %1694 = vmatpush.bf16.msrb.mxu3 %v2853_v10  ;;  %v2645_v10 = vor.u32 %v3723_v3, %v2644_v0  ;;  %v3811_v42 = vld [vmem:[#allocation2 + $0x314] sm:$0xf0]  ;;  %v3380_v56 = vld [vmem:[#allocation2 + $0x608] sm:$0xf]  ;;  %v3737_v0 = vld [vmem:[#allocation2 + $0xcc] sm:$0xf] }
  0x73   : > { %1662 = vmatpush.bf16.msrb.mxu2 %v3249_v15  ;;  %1707 = vmatpush.bf16.msra.mxu0 %v2981_v23  ;;  %v2773_v15 = vor.u32 %v3755_v8, %v2772_v7  ;;  %v2629_v23 = vor.u32 %v3719_v16, %v2628_v13  ;;  %v3867_v54 = vld [vmem:[#allocation2 + $0x4d4] sm:$0xf0]  ;;  %v2997_v59 = vor.u32 %v3811_v42, %v2996_v40  ;;  %v2854_v6 = vld [vmem:[#allocation2 + $0x1f8] sm:$0xf0]  ;;  %v3204_v8 = vld [vmem:[#allocation2 + $0x4a8] sm:$0xf] }
  0x74   : > { %1682 = vmatpush.bf16.msrb.mxu1 %v2709_v19  ;;  %v2756_v19 = vld [vmem:[#allocation2 + $0x128] sm:$0xf]  ;;  %v3907_v58 = vld [vmem:[#allocation2 + $0x614] sm:$0xf0]  ;;  %v3733_v13 = vld [vmem:[#allocation2 + $0xac] sm:$0xf] }
  0x75   : > { %v2757_v28 = vor.u32 %v3751_v20, %v2756_v19  ;;  %v3381_v3 = vor.u32 %v3907_v58, %v3380_v56  ;;  %v3895_v11 = vld [vmem:[#allocation2 + $0x5b4] sm:$0xf0]  ;;  %v2694_v16 = vld [vmem:[#allocation2 + $0xb8] sm:$0xf0]  ;;  %v3188_v20 = vld [vmem:[#allocation2 + $0x488] sm:$0xf] }
  0x76   : > { %1695 = vmatpush.bf16.msrb.mxu3 %v2837_v24  ;;  %1663 = vmatmul.bf16.vlgmr.msrb.gmra.mxu2 %v4147_v35  ;;  %v3815_v24 = vld [vmem:[#allocation2 + $0x334] sm:$0xf0]  ;;  %v3172_v33 = vld [vmem:[#allocation2 + $0x468] sm:$0xf]  ;;  %v2662_v42 = vld [vmem:[#allocation2 + $0x78] sm:$0xf0] }
  0x77   : > { %1720 = vmatpush.bf16.msra.mxu2 %v3109_v18  ;;  %1708 = vmatpush.bf16.msra.mxu0 %v2965_v37  ;;  %v3787_v18 = vld [vmem:[#allocation2 + $0x254] sm:$0xf0]  ;;  %v3013_v37 = vor.u32 %v3815_v24, %v3012_v22  ;;  %v3316_v22 = vld [vmem:[#allocation2 + $0x588] sm:$0xf]  ;;  %v2697_v24 = vor.u32 %v3733_v13, %v2694_v16  ;;  %v2646_v58 = vld [vmem:[#allocation2 + $0x58] sm:$0xf0] }
  0x78   : > { %1683 = vmatpush.bf16.msrb.mxu1 %v2693_v32  ;;  %v2901_v27 = vor.u32 %v3787_v18, %v2900_v17  ;;  %v3783_v32 = vld [vmem:[#allocation2 + $0x234] sm:$0xf0]  ;;  %v3769_v17 = vld [vmem:[#allocation2 + $0x1cc] sm:$0xf]  ;;  %v2838_v18 = vld [vmem:[#allocation2 + $0x1d8] sm:$0xf0] }
  0x79   : > { %v2841_v26 = vor.u32 %v3769_v17, %v2838_v18  ;;  %v3855_v34 = vld [vmem:[#allocation2 + $0x474] sm:$0xf0]  ;;  %v3300_v36 = vld [vmem:[#allocation2 + $0x568] sm:$0xf]  ;;  %v2982_v16 = vld [vmem:[#allocation2 + $0x2f8] sm:$0xf0] }
  0x7a   : > { %1696 = vmatpush.bf16.msrb.mxu3 %v2821_v38  ;;  %v3364_v38 = vld [vmem:[#allocation2 + $0x5e8] sm:$0xf]  ;;  %v3837_v18 = vld [vmem:[#allocation2 + $0x3ec] sm:$0xf] }
  0x7b   : > { %1721 = vmatpush.bf16.msra.mxu2 %v3093_v31  ;;  %1709 = vmatpush.bf16.msra.mxu0 %v2949_v50  ;;  %v2884_v31 = vld [vmem:[#allocation2 + $0x228] sm:$0xf]  ;;  %v3365_v53 = vor.u32 %v3903_v39, %v3364_v38  ;;  %v3725_v39 = vld [vmem:[#allocation2 + $0x6c] sm:$0xf] }
  0x7c   : > { %1684 = vmatpush.bf16.msrb.mxu1 %v2677_v46  ;;  %v2885_v43 = vor.u32 %v3783_v32, %v2884_v31  ;;  %v2726_v46 = vld [vmem:[#allocation2 + $0xf8] sm:$0xf0]  ;;  %v2868_v50 = vld [vmem:[#allocation2 + $0x208] sm:$0xf] }
  0x7d   : > { %v2822_v31 = vld [vmem:[#allocation2 + $0x1b8] sm:$0xf0]  ;;  %v3252_v13 = vld [vmem:[#allocation2 + $0x508] sm:$0xf] }
  0x7e   : > { %1697 = vmatpush.bf16.msrb.mxu3 %v2805_v52  ;;  %3387 = vmatmul.msk.bf16.vlgmr.msrb.gmra.mxu0 %vm1495_vm0, %v4139_v45  ;;  %v3779_v52 = vld [vmem:[#allocation2 + $0x214] sm:$0xf0]  ;;  %v2825_v40 = vor.u32 %v3765_v29, %v2822_v31  ;;  %v2966_v31 = vld [vmem:[#allocation2 + $0x2d8] sm:$0xf0] }
  0x7f   : > { %1722 = vmatpush.bf16.msra.mxu2 %v3077_v44  ;;  %1710 = vmatpush.bf16.msra.mxu0 %v2933_v1  ;;  %v3741_v44 = vld [vmem:[#allocation2 + $0xec] sm:$0xf]  ;;  %v2869_v63 = vor.u32 %v3779_v52, %v2868_v50  ;;  %v3221_v1 = vor.u32 %v3867_v54, %v3220_v49  ;;  %v3284_v49 = vld [vmem:[#allocation2 + $0x548] sm:$0xf]  ;;  %v3883_v50 = vld [vmem:[#allocation2 + $0x554] sm:$0xf0]  ;;  %v2665_v52 = vor.u32 %v3725_v39, %v2662_v42 }
  0x80   : > { %1685 = vmatpush.bf16.msrb.mxu1 %v2661_v61  ;;  %v3899_v61 = vld [vmem:[#allocation2 + $0x5d4] sm:$0xf0]  ;;  %v2729_v62 = vor.u32 %v3741_v44, %v2726_v46  ;;  %v2806_v44 = vld [vmem:[#allocation2 + $0x198] sm:$0xf0]  ;;  %v3865_v39 = vld [vmem:[#allocation2 + $0x4cc] sm:$0xf] }
  0x81   : > { %v3222_v42 = vld [vmem:[#allocation2 + $0x4d8] sm:$0xf0] }
  0x82   : > { %1698 = vmatpush.bf16.msrb.mxu3 %v2789_v2  ;;  %v2710_v2 = vld [vmem:[#allocation2 + $0xd8] sm:$0xf0] }
  0x83   : > { %1723 = vmatpush.bf16.msra.mxu2 %v3061_v60  ;;  %1711 = vmatpush.bf16.msra.mxu0 %v2917_v14  ;;  %v3348_v60 = vld [vmem:[#allocation2 + $0x5c8] sm:$0xf]  ;;  %v2713_v12 = vor.u32 %v3737_v0, %v2710_v2  ;;  %v2857_v14 = vor.u32 %v3773_v5, %v2854_v6 }
  0x84   : > { %1686 = vmatpush.bf16.msrb.mxu1 %v2645_v10  ;;  %v3349_v7 = vor.u32 %v3899_v61, %v3348_v60  ;;  %v3332_v10 = vld [vmem:[#allocation2 + $0x5a8] sm:$0xf]  ;;  %v2790_v60 = vld [vmem:[#allocation2 + $0x178] sm:$0xf0]  ;;  %v3285_v61 = vor.u32 %v3883_v50, %v3284_v49 }
  0x85   : > { %v3333_v19 = vor.u32 %v3895_v11, %v3332_v10  ;;  %v3268_v0 = vld [vmem:[#allocation2 + $0x528] sm:$0xf]  ;;  %v2742_v49 = vld [vmem:[#allocation2 + $0x118] sm:$0xf0] }
  0x86   : > { %1699 = vmatpush.bf16.msrb.mxu3 %v2773_v15  ;;  %v3124_v11 = vld [vmem:[#allocation2 + $0x408] sm:$0xf]  ;;  %v3078_v50 = vld [vmem:[#allocation2 + $0x3b8] sm:$0xf0] }
  0x87   : > { %1724 = vmatpush.bf16.msra.mxu2 %v3045_v9  ;;  %1712 = vmatpush.bf16.msra.mxu0 %v2901_v27  ;;  %v3863_v9 = vld [vmem:[#allocation2 + $0x4b4] sm:$0xf0] }
  0x88   : > { %1687 = vmatpush.bf16.msrb.mxu1 %v2629_v23  ;;  %v3205_v15 = vor.u32 %v3863_v9, %v3204_v8  ;;  %v3891_v23 = vld [vmem:[#allocation2 + $0x594] sm:$0xf0]  ;;  %v3753_v8 = vld [vmem:[#allocation2 + $0x14c] sm:$0xf]  ;;  %v2774_v9 = vld [vmem:[#allocation2 + $0x158] sm:$0xf0] }
  0x89   : > { %v3317_v32 = vor.u32 %v3891_v23, %v3316_v22  ;;  %v3713_v22 = vld [vmem:[#allocation2 + $0xc] sm:$0xf]  ;;  %v2614_v23 = vld [vmem:[#allocation2 + $0x18] sm:$0xf0] }
  0x8a   : > { %1700 = vmatpush.bf16.msrb.mxu3 %v2757_v28  ;;  %v2678_v28 = vld [vmem:[#allocation2 + $0x98] sm:$0xf0] }
  0x8b   : > { %1725 = vmatpush.bf16.msra.mxu2 %v3029_v21  ;;  %1713 = vmatpush.bf16.msra.mxu0 %v2885_v43  ;;  %v3859_v21 = vld [vmem:[#allocation2 + $0x494] sm:$0xf0]  ;;  %v2681_v38 = vor.u32 %v3729_v25, %v2678_v28  ;;  %v3761_v43 = vld [vmem:[#allocation2 + $0x18c] sm:$0xf] }
  0x8c   : > { %1688 = vmatpush.bf16.msrb.mxu1 %v2613_v41  ;;  %v3189_v27 = vor.u32 %v3859_v21, %v3188_v20  ;;  %v3173_v41 = vor.u32 %v3855_v34, %v3172_v33  ;;  %v2809_v54 = vor.u32 %v3761_v43, %v2806_v44  ;;  %v2777_v20 = vor.u32 %v3753_v8, %v2774_v9  ;;  %v3801_v28 = vld [vmem:[#allocation2 + $0x2cc] sm:$0xf]  ;;  %v2758_v33 = vld [vmem:[#allocation2 + $0x138] sm:$0xf0] }
  0x8d   : > { %v2617_v34 = vor.u32 %v3713_v22, %v2614_v23  ;;  %v3797_v43 = vld [vmem:[#allocation2 + $0x2ac] sm:$0xf]  ;;  %v2950_v44 = vld [vmem:[#allocation2 + $0x2b8] sm:$0xf0] }
  0x8e   : > { %1701 = vmatpush.bf16.msrb.mxu3 %v2741_v47  ;;  %v3156_v47 = vld [vmem:[#allocation2 + $0x448] sm:$0xf]  ;;  %v3857_v8 = vld [vmem:[#allocation2 + $0x48c] sm:$0xf]  ;;  %v3190_v9 = vld [vmem:[#allocation2 + $0x498] sm:$0xf0] }
  0x8f   : > { %1726 = vmatpush.bf16.msra.mxu2 %v3013_v37  ;;  %1689 = vmatmul.bf16.vlgmr.msrb.gmra.mxu1 %v4127_v55  ;;  %v3887_v37 = vld [vmem:[#allocation2 + $0x574] sm:$0xf0] }
  0x90   : > { %1733 = vmatpush.bf16.msra.mxu1 %v3237_v48  ;;  %1714 = vmatpush.bf16.msra.mxu0 %v2869_v63  ;;  %v3301_v46 = vor.u32 %v3887_v37, %v3300_v36  ;;  %v3851_v48 = vld [vmem:[#allocation2 + $0x454] sm:$0xf0]  ;;  %v3833_v36 = vld [vmem:[#allocation2 + $0x3cc] sm:$0xf]  ;;  %v3094_v37 = vld [vmem:[#allocation2 + $0x3d8] sm:$0xf0] }
  0x91   : > { %1702 = vmatmul.bf16.vlgmr.msrb.gmra.mxu3 %v4134_v4  ;;  %v3157_v56 = vor.u32 %v3851_v48, %v3156_v47  ;;  %v3847_v63 = vld [vmem:[#allocation2 + $0x434] sm:$0xf0]  ;;  %v3829_v47 = vld [vmem:[#allocation2 + $0x3ac] sm:$0xf] }
  0x92   : > { %1746 = vmatpush.bf16.msra.mxu3 %v3365_v53  ;;  %v3721_v53 = vld [vmem:[#allocation2 + $0x4c] sm:$0xf] }
  0x93   : > { %1727 = vmatpush.bf16.msra.mxu2 %v2997_v59  ;;  %1715 = vmatmul.bf16.vlgmr.msra.gmra.mxu0 %v4125_v51  ;;  %v3757_v59 = vld [vmem:[#allocation2 + $0x16c] sm:$0xf]  ;;  %v2649_v2 = vor.u32 %v3721_v53, %v2646_v58  ;;  %v3366_v53 = vld [vmem:[#allocation2 + $0x5f8] sm:$0xf0] }
  0x94   : > { %1734 = vmatpush.bf16.msra.mxu1 %v3221_v1  ;;  %1766 = vmatpush.bf16.msrb.mxu0 %v3381_v3  ;;  %v3879_v1 = vld [vmem:[#allocation2 + $0x534] sm:$0xf0]  ;;  %v3717_v3 = vld [vmem:[#allocation2 + $0x2c] sm:$0xf]  ;;  %v2793_v5 = vor.u32 %v3757_v59, %v2790_v60  ;;  %v3206_v60 = vld [vmem:[#allocation2 + $0x4b8] sm:$0xf0] }
  0x95   : > { %v3269_v10 = vor.u32 %v3879_v1, %v3268_v0  ;;  %v3745_v48 = vld [vmem:[#allocation2 + $0x10c] sm:$0xf]  ;;  %v2934_v0 = vld [vmem:[#allocation2 + $0x298] sm:$0xf0] }
  0x96   : > { %1747 = vmatpush.bf16.msra.mxu3 %v3349_v7  ;;  %1728 = vmatmul.bf16.vlgmr.msra.gmra.mxu2 %v4129_v57  ;;  %v2630_v7 = vld [vmem:[#allocation2 + $0x38] sm:$0xf0]  ;;  %v2745_v58 = vor.u32 %v3745_v48, %v2742_v49  ;;  %v3861_v59 = vld [vmem:[#allocation2 + $0x4ac] sm:$0xf]  ;;  %v4180_v49 = vld [vmem:[%s4647_s2] sm:$0xf] }
  0x97   : > { %1772 = vmatpush.bf16.msrb.mxu2 %v2729_v62  ;;  %v3140_v62 = vld [vmem:[#allocation2 + $0x428] sm:$0xf]  ;;  %v2633_v17 = vor.u32 %v3717_v3, %v2630_v7  ;;  %v3825_v1 = vld [vmem:[#allocation2 + $0x38c] sm:$0xf] }
  0x98   : > { %1785 = vmatpush.bf16.msra.mxu0 %v2857_v14  ;;  %1735 = vmatpush.bf16.msra.mxu1 %v3205_v15  ;;  %v3141_v6 = vor.u32 %v3847_v63, %v3140_v62  ;;  %v3875_v14 = vld [vmem:[#allocation2 + $0x514] sm:$0xf0]  ;;  %v3805_v15 = vld [vmem:[#allocation2 + $0x2ec] sm:$0xf] }
  0x99   : > { %v2985_v25 = vor.u32 %v3805_v15, %v2982_v16  ;;  %v3793_v63 = vld [vmem:[#allocation2 + $0x28c] sm:$0xf]  ;;  %v3046_v15 = vld [vmem:[#allocation2 + $0x378] sm:$0xf0] }
  0x9a   : > { %1748 = vmatpush.bf16.msra.mxu3 %v3333_v19  ;;  %v3110_v19 = vld [vmem:[#allocation2 + $0x3f8] sm:$0xf0]  ;;  %v3897_v3 = vld [vmem:[#allocation2 + $0x5cc] sm:$0xf]  ;;  %v2937_v7 = vor.u32 %v3793_v63, %v2934_v0 }
  0x9b   : > { %1773 = vmatpush.bf16.msrb.mxu2 %v2713_v12  ;;  %v3843_v12 = vld [vmem:[#allocation2 + $0x414] sm:$0xf0]  ;;  %v3113_v29 = vor.u32 %v3837_v18, %v3110_v19  ;;  %v3893_v16 = vld [vmem:[#allocation2 + $0x5ac] sm:$0xf]  ;;  %v3193_v18 = vor.u32 %v3857_v8, %v3190_v9  ;;  %v3286_v0 = vld [vmem:[#allocation2 + $0x558] sm:$0xf0] }
  0x9c   : > { %1786 = vmatpush.bf16.msra.mxu0 %v2841_v26  ;;  %1736 = vmatpush.bf16.msra.mxu1 %v3189_v27  ;;  %v3125_v21 = vor.u32 %v3843_v12, %v3124_v11  ;;  %v3869_v26 = vld [vmem:[#allocation2 + $0x4ec] sm:$0xf]  ;;  %v3238_v27 = vld [vmem:[#allocation2 + $0x4f8] sm:$0xf0] }
  0x9d   : > { %v3789_v12 = vld [vmem:[#allocation2 + $0x26c] sm:$0xf] }
  0x9e   : > { %1749 = vmatpush.bf16.msra.mxu3 %v3317_v32  ;;  %v3749_v32 = vld [vmem:[#allocation2 + $0x12c] sm:$0xf] }
  0x9f   : > { %1774 = vmatpush.bf16.msrb.mxu2 %v2697_v24  ;;  %v3253_v24 = vor.u32 %v3875_v14, %v3252_v13  ;;  %v3821_v13 = vld [vmem:[#allocation2 + $0x36c] sm:$0xf] }
  0xa0   : > { %1787 = vmatpush.bf16.msra.mxu0 %v2825_v40  ;;  %1737 = vmatpush.bf16.msra.mxu1 %v3173_v41  ;;  %v2969_v40 = vor.u32 %v3801_v28, %v2966_v31  ;;  %v2761_v41 = vor.u32 %v3749_v32, %v2758_v33  ;;  %v3049_v22 = vor.u32 %v3821_v13, %v3046_v15  ;;  %v3030_v28 = vld [vmem:[#allocation2 + $0x358] sm:$0xf0]  ;;  %v3881_v63 = vld [vmem:[#allocation2 + $0x54c] sm:$0xf] }
  0xa1   : > { %v3318_v31 = vld [vmem:[#allocation2 + $0x598] sm:$0xf0]  ;;  %v3841_v9 = vld [vmem:[#allocation2 + $0x40c] sm:$0xf] }
  0xa2   : > { %1750 = vmatpush.bf16.msra.mxu3 %v3301_v46  ;;  %v3097_v46 = vor.u32 %v3833_v36, %v3094_v37  ;;  %v3158_v36 = vld [vmem:[#allocation2 + $0x458] sm:$0xf0]  ;;  %v3905_v13 = vld [vmem:[#allocation2 + $0x60c] sm:$0xf] }
  0xa3   : > { %1775 = vmatpush.bf16.msrb.mxu2 %v2681_v38  ;;  %3388 = vmatmul.msk.bf16.vlgmr.msrb.gmra.mxu0 %vm1495_vm0, %v4139_v45  ;;  %v3241_v38 = vor.u32 %v3869_v26, %v3238_v27  ;;  %v3817_v26 = vld [vmem:[#allocation2 + $0x34c] sm:$0xf]  ;;  %v3382_v15 = vld [vmem:[#allocation2 + $0x618] sm:$0xf0] }
  0xa4   : > { %1788 = vmatpush.bf16.msra.mxu0 %v2809_v54  ;;  %1738 = vmatpush.bf16.msra.mxu1 %v3157_v56  ;;  %v3225_v54 = vor.u32 %v3865_v39, %v3222_v42  ;;  %v2953_v56 = vor.u32 %v3797_v43, %v2950_v44  ;;  %v3813_v42 = vld [vmem:[#allocation2 + $0x32c] sm:$0xf]  ;;  %v3014_v43 = vld [vmem:[#allocation2 + $0x338] sm:$0xf0] }
  0xa5   : > { %v3885_v44 = vld [vmem:[#allocation2 + $0x56c] sm:$0xf] }
  0xa6   : > { %1751 = vmatpush.bf16.msra.mxu3 %v3285_v61  ;;  %v3081_v61 = vor.u32 %v3829_v47, %v3078_v50 }
  0xa7   : > { %1776 = vmatpush.bf16.msrb.mxu2 %v2665_v52  ;;  %v3901_v52 = vld [vmem:[#allocation2 + $0x5ec] sm:$0xf] }
  0xa8   : > { %1789 = vmatpush.bf16.msra.mxu0 %v2793_v5  ;;  %1739 = vmatpush.bf16.msra.mxu1 %v3141_v6  ;;  %v3369_v62 = vor.u32 %v3901_v52, %v3366_v53  ;;  %v3350_v5 = vld [vmem:[#allocation2 + $0x5d8] sm:$0xf0]  ;;  %v3209_v6 = vor.u32 %v3861_v59, %v3206_v60  ;;  %v3845_v52 = vld [vmem:[#allocation2 + $0x42c] sm:$0xf] }
  0xa9   : > { %v3353_v11 = vor.u32 %v3897_v3, %v3350_v5  ;;  %v3142_v53 = vld [vmem:[#allocation2 + $0x438] sm:$0xf0]  ;;  %v3809_v60 = vld [vmem:[#allocation2 + $0x30c] sm:$0xf]  ;;  %v3923_v3 = vld [vmem:[%s4648_s3 + $0x74] sm:$0xf0] }
  0xaa   : > { %1752 = vmatpush.bf16.msra.mxu3 %v3269_v10  ;;  %v2870_v59 = vld [vmem:[#allocation2 + $0x218] sm:$0xf0]  ;;  %v3512_v5 = vld [vmem:[%s4648_s3 + $0xf0] sm:$0xf] }
  0xab   : > { %1777 = vmatpush.bf16.msrb.mxu2 %v2649_v2  ;;  %v3062_v2 = vld [vmem:[#allocation2 + $0x398] sm:$0xf0] }
  0xac   : > { %1790 = vmatpush.bf16.msra.mxu0 %v2777_v20  ;;  %1740 = vmatpush.bf16.msra.mxu1 %v3125_v21  ;;  %v3065_v10 = vor.u32 %v3825_v1, %v3062_v2  ;;  %v3853_v20 = vld [vmem:[#allocation2 + $0x46c] sm:$0xf]  ;;  %v3174_v21 = vld [vmem:[#allocation2 + $0x478] sm:$0xf0]  ;;  %v4171_v27 = vpop.f32.mrf.mxu1  ;;  %v3145_v2 = vor.u32 %v3845_v52, %v3142_v53  ;;  %v3915_v52 = vld [vmem:[%s4648_s3 + $0x34] sm:$0xf0] }
  0xad   : > { %v3177_v32 = vor.u32 %v3853_v20, %v3174_v21 }
  0xae   : > { %1753 = vmatpush.bf16.msra.mxu3 %v3253_v24  ;;  %v3785_v24 = vld [vmem:[#allocation2 + $0x24c] sm:$0xf] }
  0xaf   : > { %1778 = vmatpush.bf16.msrb.mxu2 %v2633_v17  ;;  %1741 = vmatmul.bf16.vlgmr.msra.gmra.mxu1 %v4145_v30  ;;  %v4168_v14 = vpop.f32.mrf.mxu0  ;;  %v3334_v17 = vld [vmem:[#allocation2 + $0x5b8] sm:$0xf0] }
  0xb0   : > { %1798 = vmatpush.bf16.msrb.mxu1 %v2985_v25  ;;  %1791 = vmatpush.bf16.msra.mxu0 %v2761_v41  ;;  %v3337_v23 = vor.u32 %v3893_v16, %v3334_v17  ;;  %v2902_v25 = vld [vmem:[#allocation2 + $0x258] sm:$0xf0] }
  0xb1   : > { %1754 = vmatmul.bf16.vlgmr.msra.gmra.mxu3 %v4147_v35  ;;  %v2905_v33 = vor.u32 %v3785_v24, %v2902_v25  ;;  %v2886_v41 = vld [vmem:[#allocation2 + $0x238] sm:$0xf0]  ;;  %v3385_v24 = vor.u32 %v3905_v13, %v3382_v15  ;;  %v3504_v25 = vld [vmem:[%s4648_s3 + $0xe0] sm:$0xf] }
  0xb2   : > { %1811 = vmatpush.bf16.msrb.mxu3 %v3113_v29  ;;  %v3889_v29 = vld [vmem:[#allocation2 + $0x58c] sm:$0xf]  ;;  %v3392_v15 = vld [vmem:[%s4648_s3] sm:$0xf] }
  0xb3   : > { %1779 = vmatpush.bf16.msrb.mxu2 %v2617_v34  ;;  %v3849_v34 = vld [vmem:[#allocation2 + $0x44c] sm:$0xf]  ;;  %v3321_v39 = vor.u32 %v3889_v29, %v3318_v31 }
  0xb4   : > { %1799 = vmatpush.bf16.msrb.mxu1 %v2969_v40  ;;  %1792 = vmatpush.bf16.msra.mxu0 %v2745_v58  ;;  %v4175_v37 = vpop.f32.mrf.mxu3  ;;  %v3781_v40 = vld [vmem:[#allocation2 + $0x22c] sm:$0xf]  ;;  %v3161_v48 = vor.u32 %v3849_v34, %v3158_v36  ;;  %v1523_v1 = vpop.f32.mrf.mxu1  ;;  %v3432_v34 = vld [vmem:[%s4648_s3 + $0x50] sm:$0xf]  ;;  %v3919_v36 = vld [vmem:[%s4648_s3 + $0x54] sm:$0xf0] }
  0xb5   : > { %v2889_v50 = vor.u32 %v3781_v40, %v2886_v41 }
  0xb6   : > { %1812 = vmatpush.bf16.msrb.mxu3 %v3097_v46  ;;  %1780 = vmatmul.bf16.vlgmr.msrb.gmra.mxu2 %v4127_v55  ;;  %v2918_v55 = vld [vmem:[#allocation2 + $0x278] sm:$0xf0] }
  0xb7   : > { %1824 = vmatpush.bf16.msra.mxu2 %v3241_v38  ;;  %1793 = vmatmul.bf16.vlgmr.msra.gmra.mxu0 %v4134_v4  ;;  %v2921_v19 = vor.u32 %v3789_v12, %v2918_v55  ;;  %v4173_v4 = vpop.f32.mrf.mxu2  ;;  %v3033_v38 = vor.u32 %v3817_v26, %v3030_v28  ;;  %v3302_v46 = vld [vmem:[#allocation2 + $0x578] sm:$0xf0]  ;;  %v1510_v47 = vpop.f32.mrf.mxu0  ;;  %v3289_v55 = vor.u32 %v3881_v63, %v3286_v0  ;;  %v3937_v26 = vld [vmem:[%s4648_s3 + $0xe4] sm:$0xf0]  ;;  %v3472_v0 = vld [vmem:[%s4648_s3 + $0xa0] sm:$0xf] }
  0xb8   : > { %1800 = vmatpush.bf16.msrb.mxu1 %v2953_v56  ;;  %1837 = vmatpush.bf16.msrb.mxu0 %v3369_v62  ;;  %v3017_v56 = vor.u32 %v3813_v42, %v3014_v43  ;;  %v3305_v58 = vor.u32 %v3885_v44, %v3302_v46  ;;  %v3448_v62 = vld [vmem:[%s4648_s3 + $0x70] sm:$0xf]  ;;  %v3433_v42 = vor.u32 %v3919_v36, %v3432_v34  ;;  %v3917_v43 = vld [vmem:[%s4648_s3 + $0x44] sm:$0xf0]  ;;  %v3936_v34 = vld [vmem:[%s4648_s3 + $0xe4] sm:$0xf] }
  0xb9   : > { %v3449_v17 = vor.u32 %v3923_v3, %v3448_v62  ;;  %v3933_v46 = vld [vmem:[%s4648_s3 + $0xc4] sm:$0xf0]  ;;  %v3408_v62 = vld [vmem:[%s4648_s3 + $0x20] sm:$0xf]  ;;  %v3400_v3 = vld [vmem:[%s4648_s3 + $0x10] sm:$0xf] }
  0xba   : > { %1813 = vmatpush.bf16.msrb.mxu3 %v3081_v61  ;;  %v2998_v61 = vld [vmem:[#allocation2 + $0x318] sm:$0xf0]  ;;  %v3506_v36 = vld [vmem:[%s4648_s3 + $0xe8] sm:$0xf0] }
  0xbb   : > { %1825 = vmatpush.bf16.msra.mxu2 %v3225_v54  ;;  %v3777_v54 = vld [vmem:[#allocation2 + $0x20c] sm:$0xf]  ;;  %v3001_v12 = vor.u32 %v3809_v60, %v2998_v61 }
  0xbc   : > { %1801 = vmatpush.bf16.msrb.mxu1 %v2937_v7  ;;  %1838 = vmatpush.bf16.msrb.mxu0 %v3353_v11  ;;  %v2873_v8 = vor.u32 %v3777_v54, %v2870_v59  ;;  %v507_v11 = vperm.slane %v4180_v49, 0  ;;  %v1549_v16 = vpop.f32.mrf.mxu3 }
  0xbd   : > { %v3909_v16 = vld [vmem:[%s4648_s3 + $0x4] sm:$0xf0] }
  0xbe   : > { %1814 = vmatpush.bf16.msrb.mxu3 %v3065_v10  ;;  %v3126_v10 = vld [vmem:[#allocation2 + $0x418] sm:$0xf0]  ;;  %v1509_v28 = vadd.f32 %v4168_v14, %v507_v11  ;;  %v3505_v14 = vor.u32 %v3937_v26, %v3504_v25  ;;  %v3927_v11 = vld [vmem:[%s4648_s3 + $0x94] sm:$0xf0] }
  0xbf   : > { %1826 = vmatpush.bf16.msra.mxu2 %v3209_v6  ;;  %v3939_v6 = vld [vmem:[%s4648_s3 + $0xf4] sm:$0xf0]  ;;  %v1536_v7 = vpop.f32.mrf.mxu2  ;;  %v3129_v21 = vor.u32 %v3841_v9, %v3126_v10  ;;  %v3464_v10 = vld [vmem:[%s4648_s3 + $0x90] sm:$0xf] }
  0xc0   : > { %1802 = vmatpush.bf16.msrb.mxu1 %v2921_v19  ;;  %1839 = vmatpush.bf16.msrb.mxu0 %v3337_v23  ;;  %v3270_v19 = vld [vmem:[#allocation2 + $0x538] sm:$0xf0]  ;;  %v3513_v20 = vor.u32 %v3939_v6, %v3512_v5  ;;  %v3921_v23 = vld [vmem:[%s4648_s3 + $0x64] sm:$0xf0]  ;;  %v1522_v40 = vadd.f32 %v4171_v27, %v1509_v28  ;;  %v3488_v27 = vld [vmem:[%s4648_s3 + $0xc0] sm:$0xf] }
  0xc1   : > { %v3489_v53 = vor.u32 %v3933_v46, %v3488_v27  ;;  %v3911_v5 = vld [vmem:[%s4648_s3 + $0x14] sm:$0xf0] }
  0xc2   : > { %1815 = vmatpush.bf16.msrb.mxu3 %v3049_v22  ;;  %v3440_v22 = vld [vmem:[%s4648_s3 + $0x60] sm:$0xf] }
  0xc3   : > { %1827 = vmatpush.bf16.msra.mxu2 %v3193_v18  ;;  %v3877_v18 = vld [vmem:[#allocation2 + $0x52c] sm:$0xf]  ;;  %v3441_v31 = vor.u32 %v3921_v23, %v3440_v22  ;;  %v3514_v22 = vld [vmem:[%s4648_s3 + $0xf8] sm:$0xf0]  ;;  %v3393_v23 = vor.u32 %v3909_v16, %v3392_v15 }
  0xc4   : > { %1803 = vmatpush.bf16.msrb.mxu1 %v2905_v33  ;;  %1840 = vmatpush.bf16.msrb.mxu0 %v3321_v39  ;;  %v3273_v29 = vor.u32 %v3877_v18, %v3270_v19  ;;  %v3254_v33 = vld [vmem:[#allocation2 + $0x518] sm:$0xf0]  ;;  %v3496_v39 = vld [vmem:[%s4648_s3 + $0xd0] sm:$0xf]  ;;  %v3465_v18 = vor.u32 %v3927_v11, %v3464_v10  ;;  %v3456_v19 = vld [vmem:[%s4648_s3 + $0x80] sm:$0xf] }
  0xc5   : > { %v3928_v10 = vld [vmem:[%s4648_s3 + $0xa4] sm:$0xf]  ;;  %v3474_v11 = vld [vmem:[%s4648_s3 + $0xa8] sm:$0xf0]  ;;  %v3402_v15 = vld [vmem:[%s4648_s3 + $0x18] sm:$0xf0] }
  0xc6   : > { %1816 = vmatpush.bf16.msrb.mxu3 %v3033_v38 }
  0xc7   : > { %1828 = vmatpush.bf16.msra.mxu2 %v3177_v32  ;;  %v3873_v32 = vld [vmem:[#allocation2 + $0x50c] sm:$0xf]  ;;  %v1586_v38 = vpop.f32.mrf.mxu2 }
  0xc8   : > { %1804 = vmatpush.bf16.msrb.mxu1 %v2889_v50  ;;  %1841 = vmatpush.bf16.msrb.mxu0 %v3305_v58  ;;  %v3257_v41 = vor.u32 %v3873_v32, %v3254_v33  ;;  %v3416_v50 = vld [vmem:[%s4648_s3 + $0x30] sm:$0xf]  ;;  %v3931_v58 = vld [vmem:[%s4648_s3 + $0xb4] sm:$0xf0] }
  0xc9   : > { %v3417_v60 = vor.u32 %v3915_v52, %v3416_v50  ;;  %v3916_v50 = vld [vmem:[%s4648_s3 + $0x44] sm:$0xf]  ;;  %v3426_v52 = vld [vmem:[%s4648_s3 + $0x48] sm:$0xf0] }
  0xca   : > { %1817 = vmatpush.bf16.msrb.mxu3 %v3017_v56 }
  0xcb   : > { %1829 = vmatpush.bf16.msra.mxu2 %v3161_v48  ;;  %v1560_v48 = vpop.f32.mrf.mxu0 }
  0xcc   : > { %1805 = vmatpush.bf16.msrb.mxu1 %v2873_v8  ;;  %1842 = vmatpush.bf16.msrb.mxu0 %v3289_v55  ;;  %v3401_v55 = vor.u32 %v3911_v5, %v3400_v3 }
  0xce   : > { %1818 = vmatpush.bf16.msrb.mxu3 %v3001_v12  ;;  %v1573_v54 = vpop.f32.mrf.mxu1 }
  0xcf   : > { %1830 = vmatpush.bf16.msra.mxu2 %v3145_v2  ;;  %1806 = vmatmul.bf16.vlgmr.msrb.gmra.mxu1 %v4125_v51  ;;  %v3935_v51 = vld [vmem:[%s4648_s3 + $0xd4] sm:$0xf0]  ;;  %v1588_v56 = vpop.f32.mrf.mxu2 }
  0xd0   : > { %2274 = vmatpush.bf16.msra.mxu1 %v3513_v20  ;;  %1843 = vmatpush.bf16.msrb.mxu0 %v3273_v29  ;;  %v3497_v44 = vor.u32 %v3935_v51, %v3496_v39  ;;  %v3925_v20 = vld [vmem:[%s4648_s3 + $0x84] sm:$0xf0]  ;;  %v3920_v29 = vld [vmem:[%s4648_s3 + $0x64] sm:$0xf]  ;;  %v3918_v51 = vld [vmem:[%s4648_s3 + $0x54] sm:$0xf] }
  0xd1   : > { %1819 = vmatmul.bf16.vlgmr.msrb.gmra.mxu3 %v4129_v57  ;;  %v3424_v57 = vld [vmem:[%s4648_s3 + $0x40] sm:$0xf]  ;;  %v3457_v28 = vor.u32 %v3925_v20, %v3456_v19  ;;  %v3949_v19 = vld [vmem:[%s4648_s3 + $0x144] sm:$0xf0] }
  0xd2   : > { %2261 = vmatpush.bf16.msra.mxu3 %v3449_v17  ;;  %v3425_v47 = vor.u32 %v3917_v43, %v3424_v57  ;;  %v3922_v17 = vld [vmem:[%s4648_s3 + $0x74] sm:$0xf]  ;;  %v3498_v43 = vld [vmem:[%s4648_s3 + $0xd8] sm:$0xf0] }
  0xd3   : > { %1831 = vmatpush.bf16.msra.mxu2 %v3129_v21  ;;  %v1562_v6 = vpop.f32.mrf.mxu0  ;;  %v3938_v21 = vld [vmem:[%s4648_s3 + $0xf4] sm:$0xf] }
  0xd4   : > { %2275 = vmatpush.bf16.msra.mxu1 %v3505_v14  ;;  %1844 = vmatpush.bf16.msrb.mxu0 %v3257_v41  ;;  %v1599_v7 = vpop.f32.mrf.mxu3  ;;  %v3517_v32 = vor.u32 %v3938_v21, %v3514_v22  ;;  %v508_v14 = vperm.slane %v4180_v49, 1  ;;  %v3509_v41 = vor.u32 %v3936_v34, %v3506_v36  ;;  %v3934_v57 = vld [vmem:[%s4648_s3 + $0xd4] sm:$0xf]  ;;  %v3912_v6 = vld [vmem:[%s4648_s3 + $0x24] sm:$0xf] }
  0xd5   : > { %v3466_v21 = vld [vmem:[%s4648_s3 + $0x98] sm:$0xf0]  ;;  %v3536_v34 = vld [vmem:[%s4648_s3 + $0x120] sm:$0xf]  ;;  %v3945_v36 = vld [vmem:[%s4648_s3 + $0x124] sm:$0xf0] }
  0xd6   : > { %2262 = vmatpush.bf16.msra.mxu3 %v3441_v31  ;;  %1832 = vmatmul.bf16.vlgmr.msra.gmra.mxu2 %v4145_v30  ;;  %v1535_v30 = vadd.f32 %v4173_v4, %v1522_v40  ;;  %v3480_v4 = vld [vmem:[%s4648_s3 + $0xb0] sm:$0xf]  ;;  %v1575_v9 = vpop.f32.mrf.mxu1  ;;  %v3442_v31 = vld [vmem:[%s4648_s3 + $0x68] sm:$0xf0]  ;;  %v3434_v40 = vld [vmem:[%s4648_s3 + $0x58] sm:$0xf0]  ;;  %v1600_v27 = vadd.f32 %v1599_v7, %v508_v14 }
  0xd7   : > { %1857 = vmatpush.bf16.msrb.mxu2 %v3385_v24  ;;  %1845 = vmatmul.bf16.vlgmr.msrb.gmra.mxu0 %v4147_v35  ;;  %v3913_v35 = vld [vmem:[%s4648_s3 + $0x24] sm:$0xf0]  ;;  %v3481_v63 = vor.u32 %v3931_v58, %v3480_v4  ;;  %v3445_v39 = vor.u32 %v3920_v29, %v3442_v31  ;;  %v3490_v4 = vld [vmem:[%s4648_s3 + $0xc8] sm:$0xf0]  ;;  %v3560_v58 = vld [vmem:[%s4648_s3 + $0x150] sm:$0xf] }
  0xd8   : > { %2276 = vmatpush.bf16.msra.mxu1 %v3497_v44  ;;  %v1548_v59 = vadd.f32 %v4175_v37, %v1535_v30  ;;  %v3929_v37 = vld [vmem:[%s4648_s3 + $0xa4] sm:$0xf0]  ;;  %v3409_v1 = vor.u32 %v3913_v35, %v3408_v62  ;;  %v3955_v44 = vld [vmem:[%s4648_s3 + $0x174] sm:$0xf0]  ;;  %v3568_v30 = vld [vmem:[%s4648_s3 + $0x160] sm:$0xf] }
  0xd9   : > { %v3473_v8 = vor.u32 %v3929_v37, %v3472_v0  ;;  %v1612_v12 = vpop.f32.mrf.mxu2  ;;  %v3914_v62 = vld [vmem:[%s4648_s3 + $0x34] sm:$0xf]  ;;  %v3418_v35 = vld [vmem:[%s4648_s3 + $0x38] sm:$0xf0]  ;;  %v3410_v7 = vld [vmem:[%s4648_s3 + $0x28] sm:$0xf0] }
  0xda   : > { %2263 = vmatpush.bf16.msra.mxu3 %v3433_v42  ;;  %v1561_v61 = vadd.f32 %v1560_v48, %v1548_v59  ;;  %v3576_v42 = vld [vmem:[%s4648_s3 + $0x170] sm:$0xf]  ;;  %v3437_v48 = vor.u32 %v3918_v51, %v3434_v40  ;;  %v3951_v59 = vld [vmem:[%s4648_s3 + $0x154] sm:$0xf0]  ;;  %v3421_v5 = vor.u32 %v3914_v62, %v3418_v35  ;;  %v3908_v29 = vld [vmem:[%s4648_s3 + $0x4] sm:$0xf] }
  0xdb   : > { %v3577_v46 = vor.u32 %v3955_v44, %v3576_v42  ;;  %v3561_v0 = vor.u32 %v3951_v59, %v3560_v58  ;;  %v3458_v51 = vld [vmem:[%s4648_s3 + $0x88] sm:$0xf0]  ;;  %v3537_v42 = vor.u32 %v3945_v36, %v3536_v34  ;;  %v3528_v44 = vld [vmem:[%s4648_s3 + $0x110] sm:$0xf]  ;;  %v3954_v58 = vld [vmem:[%s4648_s3 + $0x174] sm:$0xf] }
  0xdc   : > { %2277 = vmatpush.bf16.msra.mxu1 %v3489_v53  ;;  %v1574_v2 = vadd.f32 %v1573_v54, %v1561_v61  ;;  %v1601_v26 = vpop.f32.mrf.mxu3  ;;  %v3501_v53 = vor.u32 %v3934_v57, %v3498_v43  ;;  %v3932_v54 = vld [vmem:[%s4648_s3 + $0xc4] sm:$0xf]  ;;  %v3429_v61 = vor.u32 %v3916_v50, %v3426_v52  ;;  %v3520_v52 = vld [vmem:[%s4648_s3 + $0x100] sm:$0xf]  ;;  %v3578_v59 = vld [vmem:[%s4648_s3 + $0x178] sm:$0xf0] }
  0xdd   : > { %2287 = vmatpush.bf16.msra.mxu2 %v3577_v46 }
  0xde   : > { %2264 = vmatpush.bf16.msra.mxu3 %v3425_v47  ;;  %v1587_v13 = vadd.f32 %v1586_v38, %v1574_v2  ;;  %v3953_v47 = vld [vmem:[%s4648_s3 + $0x164] sm:$0xf0]  ;;  %v3482_v2 = vld [vmem:[%s4648_s3 + $0xb8] sm:$0xf0] }
  0xdf   : > { %v3569_v56 = vor.u32 %v3953_v47, %v3568_v30 }
  0xe0   : > { %2278 = vmatpush.bf16.msra.mxu1 %v3481_v63  ;;  %v1863_v24 = vmax.f32 %v1587_v13, 0.0  ;;  %v3493_v63 = vor.u32 %v3932_v54, %v3490_v4  ;;  %v3910_v13 = vld [vmem:[%s4648_s3 + $0x14] sm:$0xf] }
  0xe1   : > { %v1614_v33 = vpop.f32.mrf.mxu2  ;;  %2288 = vmatpush.bf16.msra.mxu2 %v3569_v56 }
  0xe2   : > { %2265 = vmatpush.bf16.msra.mxu3 %v3417_v60  ;;  %v4314_v38 = vpack.c.bf16 %v1863_v24, %v1863_v24  ;;  %v1613_v60 = vadd.f32 %v1612_v12, %v1600_v27  ;;  %v3947_v24 = vld [vmem:[%s4648_s3 + $0x134] sm:$0xf0] }
  0xe3   : > { %v3943_v27 = vld [vmem:[%s4648_s3 + $0x114] sm:$0xf0] }
  0xe4   : > { %2279 = vmatpush.bf16.msra.mxu1 %v3473_v8 }
  0xe5   : > { %2289 = vmatpush.bf16.msra.mxu2 %v3561_v0  ;;  %v3562_v0 = vld [vmem:[%s4648_s3 + $0x158] sm:$0xf0] }
  0xe6   : > { %2266 = vmatpush.bf16.msra.mxu3 %v3409_v1  ;;  %3389 = vmatmul.msk.bf16.vlgmr.msrb.gmra.mxu2 %vm1495_vm0, %v4139_v45  ;;  %v3450_v45 = vld [vmem:[%s4648_s3 + $0x78] sm:$0xf0]  ;;  %v3930_v1 = vld [vmem:[%s4648_s3 + $0xb4] sm:$0xf] }
  0xe7   : > { %v3453_v25 = vor.u32 %v3922_v17, %v3450_v45  ;;  %v3485_v8 = vor.u32 %v3930_v1, %v3482_v2  ;;  %v3477_v17 = vor.u32 %v3928_v10, %v3474_v11  ;;  %v3552_v45 = vld [vmem:[%s4648_s3 + $0x140] sm:$0xf]  ;;  %v3948_v2 = vld [vmem:[%s4648_s3 + $0x144] sm:$0xf]  ;;  %v3546_v10 = vld [vmem:[%s4648_s3 + $0x138] sm:$0xf0] }
  0xe8   : > { %2280 = vmatpush.bf16.msra.mxu1 %v3465_v18  ;;  %v3926_v18 = vld [vmem:[%s4648_s3 + $0x94] sm:$0xf]  ;;  %v3553_v22 = vor.u32 %v3949_v19, %v3552_v45  ;;  %v3969_v19 = vld [vmem:[%s4648_s3 + $0x1e4] sm:$0xf0] }
  0xe9   : > { %v3469_v33 = vor.u32 %v3926_v18, %v3466_v21  ;;  %v3632_v18 = vld [vmem:[%s4648_s3 + $0x1e0] sm:$0xf]  ;;  %v3942_v21 = vld [vmem:[%s4648_s3 + $0x114] sm:$0xf] }
  0xea   : > { %2267 = vmatpush.bf16.msra.mxu3 %v3401_v55  ;;  %v3413_v55 = vor.u32 %v3912_v6, %v3410_v7  ;;  %2290 = vmatpush.bf16.msra.mxu2 %v3553_v22  ;;  %v3530_v22 = vld [vmem:[%s4648_s3 + $0x118] sm:$0xf0] }
  0xeb   : > { %v1625_v37 = vpop.f32.mrf.mxu0 }
  0xec   : > { %2281 = vmatpush.bf16.msra.mxu1 %v3457_v28  ;;  %v1626_v3 = vadd.f32 %v1625_v37, %v1613_v60  ;;  %v3405_v28 = vor.u32 %v3910_v13, %v3402_v15  ;;  %v3581_v60 = vor.u32 %v3954_v58, %v3578_v59  ;;  %v3971_v13 = vld [vmem:[%s4648_s3 + $0x1f4] sm:$0xf0] }
  0xee   : > { %2268 = vmatpush.bf16.msra.mxu3 %v3393_v23  ;;  %v1638_v9 = vpop.f32.mrf.mxu1  ;;  %v3544_v23 = vld [vmem:[%s4648_s3 + $0x130] sm:$0xf] }
  0xef   : > { %v1639_v12 = vadd.f32 %v1638_v9, %v1626_v3  ;;  %v3545_v31 = vor.u32 %v3947_v24, %v3544_v23  ;;  %v3554_v3 = vld [vmem:[%s4648_s3 + $0x148] sm:$0xf0]  ;;  %v3946_v9 = vld [vmem:[%s4648_s3 + $0x134] sm:$0xf]  ;;  %v3624_v23 = vld [vmem:[%s4648_s3 + $0x1d0] sm:$0xf] }
  0xf0   : > { %2326 = vmatpush.bf16.msrb.mxu1 %v3517_v32  ;;  %v3394_v32 = vld [vmem:[%s4648_s3 + $0x8] sm:$0xf0]  ;;  %v3557_v6 = vor.u32 %v3948_v2, %v3554_v3  ;;  %v3967_v24 = vld [vmem:[%s4648_s3 + $0x1d4] sm:$0xf0] }
  0xf1   : > { %2269 = vmatmul.bf16.vlgmr.msra.gmra.mxu3 %v4314_v38  ;;  %2291 = vmatpush.bf16.msra.mxu2 %v3545_v31  ;;  %v3625_v31 = vor.u32 %v3967_v24, %v3624_v23  ;;  %v3958_v24 = vld [vmem:[%s4648_s3 + $0x194] sm:$0xf] }
  0xf2   : > { %2313 = vmatpush.bf16.msrb.mxu3 %v3453_v25 }
  0xf3   : > { %v1627_v20 = vpop.f32.mrf.mxu0 }
  0xf4   : > { %2327 = vmatpush.bf16.msrb.mxu1 %v3509_v41  ;;  %v1651_v16 = vpop.f32.mrf.mxu3  ;;  %v3397_v41 = vor.u32 %v3908_v29, %v3394_v32  ;;  %v3633_v20 = vor.u32 %v3969_v19, %v3632_v18  ;;  %v3533_v29 = vor.u32 %v3942_v21, %v3530_v22  ;;  %v3940_v32 = vld [vmem:[%s4648_s3 + $0x104] sm:$0xf]  ;;  %v3610_v18 = vld [vmem:[%s4648_s3 + $0x1b8] sm:$0xf0]  ;;  %v3602_v21 = vld [vmem:[%s4648_s3 + $0x1a8] sm:$0xf0] }
  0xf5   : > { %v1652_v25 = vadd.f32 %v1651_v16, %v1639_v12  ;;  %2292 = vmatpush.bf16.msra.mxu2 %v3537_v42  ;;  %v3549_v12 = vor.u32 %v3946_v9, %v3546_v10  ;;  %v3944_v16 = vld [vmem:[%s4648_s3 + $0x124] sm:$0xf]  ;;  %v510_v22 = vperm.slane %v4180_v49, 3 }
  0xf6   : > { %2314 = vmatpush.bf16.msrb.mxu3 %v3445_v39  ;;  %v1640_v14 = vpop.f32.mrf.mxu1  ;;  %v3924_v39 = vld [vmem:[%s4648_s3 + $0x84] sm:$0xf] }
  0xf7   : > { %v3461_v57 = vor.u32 %v3924_v39, %v3458_v51  ;;  %v3616_v39 = vld [vmem:[%s4648_s3 + $0x1c0] sm:$0xf]  ;;  %v3965_v51 = vld [vmem:[%s4648_s3 + $0x1c4] sm:$0xf0] }
  0xf8   : > { %2328 = vmatpush.bf16.msrb.mxu1 %v3501_v53  ;;  %v3941_v53 = vld [vmem:[%s4648_s3 + $0x104] sm:$0xf0] }
  0xf9   : > { %v1664_v26 = vpop.f32.mrf.mxu2  ;;  %v3521_v56 = vor.u32 %v3941_v53, %v3520_v52 }
  0xfa   : > { %2315 = vmatpush.bf16.msrb.mxu3 %v3437_v48  ;;  %v1665_v40 = vadd.f32 %v1664_v26, %v1652_v25  ;;  %v3529_v48 = vor.u32 %v3943_v27, %v3528_v44  ;;  %v509_v25 = vperm.slane %v4180_v49, 2  ;;  %v3956_v49 = vld [vmem:[%s4648_s3 + $0x184] sm:$0xf] }
  0xfb   : > { %v1677_v46 = vpop.f32.mrf.mxu0 }
  0xfc   : > { %2329 = vmatpush.bf16.msrb.mxu1 %v3493_v63  ;;  %v1653_v43 = vpop.f32.mrf.mxu3  ;;  %v1678_v30 = vadd.f32 %v1677_v46, %v1665_v40  ;;  %2293 = vmatpush.bf16.msra.mxu2 %v3529_v48  ;;  %v3950_v63 = vld [vmem:[%s4648_s3 + $0x154] sm:$0xf] }
  0xfd   : > { %v3565_v1 = vor.u32 %v3950_v63, %v3562_v0  ;;  %v3963_v43 = vld [vmem:[%s4648_s3 + $0x1b4] sm:$0xf0] }
  0xfe   : > { %2316 = vmatpush.bf16.msrb.mxu3 %v3429_v61  ;;  %v1864_v50 = vmax.f32 %v1678_v30, 0.0  ;;  %v3952_v61 = vld [vmem:[%s4648_s3 + $0x164] sm:$0xf]  ;;  %v3600_v30 = vld [vmem:[%s4648_s3 + $0x1a0] sm:$0xf] }
 0x100   : > { %2330 = vmatpush.bf16.msrb.mxu1 %v3485_v8  ;;  %v1868_v54 = vpack.c.bf16 %v1864_v50, %v1864_v50  ;;  %2294 = vmatpush.bf16.msra.mxu2 %v3521_v56  ;;  %v3959_v56 = vld [vmem:[%s4648_s3 + $0x194] sm:$0xf0] }
 0x101   : > { %v1666_v47 = vpop.f32.mrf.mxu2 }
 0x102   : > { %2317 = vmatpush.bf16.msrb.mxu3 %v3421_v5  ;;  %2282 = vmatmul.bf16.vlgmr.msra.gmra.mxu1 %v1868_v54  ;;  %v3961_v47 = vld [vmem:[%s4648_s3 + $0x1a4] sm:$0xf0] }
 0x103   : > { %v1679_v4 = vpop.f32.mrf.mxu0  ;;  %v3601_v50 = vor.u32 %v3961_v47, %v3600_v30 }
 0x104   : > { %2331 = vmatpush.bf16.msrb.mxu1 %v3477_v17  ;;  %2339 = vmatpush.bf16.msrb.mxu2 %v3581_v60  ;;  %v3538_v17 = vld [vmem:[%s4648_s3 + $0x128] sm:$0xf0] }
 0x105   : > { %v3541_v45 = vor.u32 %v3944_v16, %v3538_v17  ;;  %v3962_v17 = vld [vmem:[%s4648_s3 + $0x1b4] sm:$0xf] }
 0x106   : > { %2318 = vmatpush.bf16.msrb.mxu3 %v3413_v55  ;;  %v3640_v55 = vld [vmem:[%s4648_s3 + $0x1f0] sm:$0xf]  ;;  %v3613_v19 = vor.u32 %v3962_v17, %v3610_v18  ;;  %v3981_v17 = vld [vmem:[%s4650_s5 + $0x48] sm:$0xff] }
 0x107   : > { %v3641_v15 = vor.u32 %v3971_v13, %v3640_v55  ;;  %v3964_v13 = vld [vmem:[%s4648_s3 + $0x1c4] sm:$0xf] }
 0x108   : > { %2332 = vmatpush.bf16.msrb.mxu1 %v3469_v33  ;;  %v3522_v33 = vld [vmem:[%s4648_s3 + $0x108] sm:$0xf0] }
 0x109   : > { %2300 = vmatpush.bf16.msra.mxu0 %v3641_v15  ;;  %v3525_v14 = vor.u32 %v3940_v32, %v3522_v33  ;;  %v3618_v15 = vld [vmem:[%s4648_s3 + $0x1c8] sm:$0xf0] }
 0x10a   : > { %2319 = vmatpush.bf16.msrb.mxu3 %v3405_v28  ;;  %v3621_v16 = vor.u32 %v3964_v13, %v3618_v15  ;;  %v3983_v13 = vld [vmem:[%s4650_s5 + $0x58] sm:$0xff] }
 0x10c   : > { %2333 = vmatpush.bf16.msrb.mxu1 %v3461_v57  ;;  %v1690_v35 = vpop.f32.mrf.mxu1  ;;  %v3608_v57 = vld [vmem:[%s4648_s3 + $0x1b0] sm:$0xf] }
 0x10d   : > { %2301 = vmatpush.bf16.msra.mxu0 %v3633_v20  ;;  %v1691_v36 = vadd.f32 %v1690_v35, %v509_v25  ;;  %v3609_v46 = vor.u32 %v3963_v43, %v3608_v57  ;;  %v3960_v20 = vld [vmem:[%s4648_s3 + $0x1a4] sm:$0xf]  ;;  %v3594_v25 = vld [vmem:[%s4648_s3 + $0x198] sm:$0xf0] }
 0x10e   : > { %2320 = vmatpush.bf16.msrb.mxu3 %v3397_v41  ;;  %v3617_v41 = vor.u32 %v3965_v51, %v3616_v39  ;;  %v3605_v23 = vor.u32 %v3960_v20, %v3602_v21 }
 0x110   : > { %v1716_v37 = vpop.f32.mrf.mxu0 }
 0x111   : > { %2321 = vmatmul.bf16.vlgmr.msrb.gmra.mxu3 %v4314_v38  ;;  %v3570_v38 = vld [vmem:[%s4648_s3 + $0x168] sm:$0xf0]  ;;  %2302 = vmatpush.bf16.msra.mxu0 %v3625_v31 }
 0x112   : > { %v3573_v62 = vor.u32 %v3952_v61, %v3570_v38  ;;  %2334 = vmatmul.bf16.vlgmr.msrb.gmra.mxu1 %v1868_v54  ;;  %v3592_v54 = vld [vmem:[%s4648_s3 + $0x190] sm:$0xf]  ;;  %v3584_v38 = vld [vmem:[%s4648_s3 + $0x180] sm:$0xf] }
 0x113   : > { %v3593_v59 = vor.u32 %v3959_v56, %v3592_v54 }
 0x114   : > { %2340 = vmatpush.bf16.msrb.mxu2 %v3573_v62  ;;  %v1692_v5 = vpop.f32.mrf.mxu1  ;;  %v1703_v8 = vpop.f32.mrf.mxu3  ;;  %v3957_v62 = vld [vmem:[%s4648_s3 + $0x184] sm:$0xf0] }
 0x115   : > { %v1704_v40 = vadd.f32 %v1703_v8, %v1691_v36  ;;  %2303 = vmatpush.bf16.msra.mxu0 %v3617_v41  ;;  %v3585_v63 = vor.u32 %v3957_v62, %v3584_v38  ;;  %v3968_v5 = vld [vmem:[%s4648_s3 + $0x1e4] sm:$0xf] }
 0x117   : > { %v1717_v44 = vadd.f32 %v1716_v37, %v1704_v40  ;;  %v3970_v37 = vld [vmem:[%s4648_s3 + $0x1f4] sm:$0xf] }
 0x118   : > { %2341 = vmatpush.bf16.msrb.mxu2 %v3565_v1  ;;  %v1718_v11 = vpop.f32.mrf.mxu0  ;;  %v3642_v1 = vld [vmem:[%s4648_s3 + $0x1f8] sm:$0xf0] }
 0x119   : > { %v1729_v7 = vpop.f32.mrf.mxu2  ;;  %2304 = vmatpush.bf16.msra.mxu0 %v3609_v46  ;;  %v3645_v2 = vor.u32 %v3970_v37, %v3642_v1  ;;  %v3966_v11 = vld [vmem:[%s4648_s3 + $0x1d4] sm:$0xf]  ;;  %v3977_v1 = vld [vmem:[%s4650_s5 + $0x28] sm:$0xff] }
 0x11a   : > { %v1730_v48 = vadd.f32 %v1729_v7, %v1717_v44  ;;  %v3978_v37 = vld [vmem:[%s4650_s5 + $0x30] sm:$0xff] }
 0x11c   : > { %2342 = vmatpush.bf16.msrb.mxu2 %v3557_v6  ;;  %v1705_v28 = vpop.f32.mrf.mxu3  ;;  %v3634_v6 = vld [vmem:[%s4648_s3 + $0x1e8] sm:$0xf0] }
 0x11d   : > { %2305 = vmatpush.bf16.msra.mxu0 %v3601_v50  ;;  %v3637_v8 = vor.u32 %v3968_v5, %v3634_v6  ;;  %v3986_v5 = vld [vmem:[%s4650_s5 + $0x70] sm:$0xff]  ;;  %v3975_v6 = vld [vmem:[%s4650_s5 + $0x18] sm:$0xff] }
 0x120   : > { %2343 = vmatpush.bf16.msrb.mxu2 %v3549_v12  ;;  %v1768_v34 = vpop.f32.mrf.mxu0  ;;  %v3626_v12 = vld [vmem:[%s4648_s3 + $0x1d8] sm:$0xf0] }
 0x121   : > { %v1731_v26 = vpop.f32.mrf.mxu2  ;;  %2306 = vmatpush.bf16.msra.mxu0 %v3593_v59  ;;  %v3629_v55 = vor.u32 %v3966_v11, %v3626_v12  ;;  %v3972_v12 = vld [vmem:[%s4650_s5] sm:$0xff] }
 0x122   : > { %v3597_v26 = vor.u32 %v3958_v24, %v3594_v25 }
 0x124   : > { %2344 = vmatpush.bf16.msrb.mxu2 %v3541_v45 }
 0x125   : > { %2307 = vmatpush.bf16.msra.mxu0 %v3585_v63 }
 0x128   : > { %2345 = vmatpush.bf16.msrb.mxu2 %v3533_v29  ;;  %v1770_v42 = vpop.f32.mrf.mxu0 }
 0x129   : > { %2352 = vmatpush.bf16.msrb.mxu0 %v3645_v2  ;;  %v3976_v2 = vld [vmem:[%s4650_s5 + $0x20] sm:$0xff] }
 0x12c   : > { %2346 = vmatpush.bf16.msrb.mxu2 %v3525_v14  ;;  %v1742_v27 = vpop.f32.mrf.mxu1 }
 0x12d   : > { %v1743_v52 = vadd.f32 %v1742_v27, %v1730_v48  ;;  %2353 = vmatpush.bf16.msrb.mxu0 %v3637_v8  ;;  %v3974_v8 = vld [vmem:[%s4650_s5 + $0x10] sm:$0xff] }
 0x131   : > { %2354 = vmatpush.bf16.msrb.mxu0 %v3629_v55  ;;  %v3984_v55 = vld [vmem:[%s4650_s5 + $0x60] sm:$0xff] }
 0x134   : > { %v1755_v53 = vpop.f32.mrf.mxu3  ;;  %v1744_v58 = vpop.f32.mrf.mxu1 }
 0x135   : > { %v1756_v4 = vadd.f32 %v1755_v53, %v1743_v52  ;;  %v1794_v61 = vpop.f32.mrf.mxu0  ;;  %2355 = vmatpush.bf16.msrb.mxu0 %v3621_v16  ;;  %v1935_v52 = vld [vmem:[%s4649_s4] sm:$0x3]  ;;  %v3982_v16 = vld [vmem:[%s4650_s5 + $0x50] sm:$0xff] }
 0x136   : > { %v1937_v53 = vperm.slane %v1935_v52, 0 }
 0x137   : > { %v1769_v35 = vadd.f32 %v1768_v34, %v1756_v4  ;;  %v3586_v34 = vld [vmem:[%s4648_s3 + $0x188] sm:$0xf0] }
 0x138   : > { %v3589_v14 = vor.u32 %v3956_v49, %v3586_v34  ;;  %v4010_v49 = vld [vmem:[%s4651_s6] ss:$0 sm:$0xff] }
 0x139   : > { %v1781_v60 = vpop.f32.mrf.mxu2  ;;  %v1865_v0 = vmax.f32 %v1769_v35, 0.0  ;;  %2356 = vmatpush.bf16.msrb.mxu0 %v3613_v19 }
 0x13a   : > { %v1782_v29 = vadd.f32 %v1781_v60, %v510_v22  ;;  %v1938_v60 = vperm.slane %v1935_v52, 1 }
 0x13b   : > { %v1869_v3 = vpack.c.bf16 %v1865_v0, %v1865_v0  ;;  %v3979_v0 = vld [vmem:[%s4650_s5 + $0x38] sm:$0xff] }
 0x13c   : > { %v1757_v7 = vpop.f32.mrf.mxu3  ;;  %v1795_v36 = vadd.f32 %v1794_v61, %v1782_v29  ;;  %2501 = vmatpush.bf16.msra.mxu3 %v3979_v0 }
 0x13d   : > { %2295 = vmatmul.bf16.vlgmr.msra.gmra.mxu2 %v1869_v3  ;;  %v1796_v10 = vpop.f32.mrf.mxu0  ;;  %2357 = vmatpush.bf16.msrb.mxu0 %v3605_v23 }
 0x13e   : > { %v3985_v10 = vld [vmem:[%s4650_s5 + $0x68] sm:$0xff] }
 0x140   : > { %2502 = vmatpush.bf16.msra.mxu3 %v3978_v37 }
 0x141   : > { %v1783_v9 = vpop.f32.mrf.mxu2  ;;  %2358 = vmatpush.bf16.msrb.mxu0 %v3597_v26 }
 0x142   : > { %v3973_v9 = vld [vmem:[%s4650_s5 + $0x8] sm:$0xff] }
 0x144   : > { %2503 = vmatpush.bf16.msra.mxu3 %v3977_v1 }
 0x145   : > { %2359 = vmatpush.bf16.msrb.mxu0 %v3589_v14 }
 0x148   : > { %2504 = vmatpush.bf16.msra.mxu3 %v3976_v2 }
 0x14c   : > { %v1807_v45 = vpop.f32.mrf.mxu1  ;;  %2505 = vmatpush.bf16.msra.mxu3 %v3975_v6 }
 0x14d   : > { %2347 = vmatmul.bf16.vlgmr.msrb.gmra.mxu2 %v1869_v3  ;;  %v1808_v39 = vadd.f32 %v1807_v45, %v1795_v36  ;;  %v3987_v3 = vld [vmem:[%s4650_s5 + $0x78] sm:$0xff]  ;;  %v3980_v45 = vld [vmem:[%s4650_s5 + $0x40] sm:$0xff] }
 0x14e   : > { %2514 = vmatpush.bf16.msra.mxu1 %v3987_v3 }
 0x150   : > { %2506 = vmatpush.bf16.msra.mxu3 %v3974_v8 }
 0x152   : > { %2515 = vmatpush.bf16.msra.mxu1 %v3986_v5 }
 0x154   : > { %v1820_v28 = vpop.f32.mrf.mxu3  ;;  %v1809_v31 = vpop.f32.mrf.mxu1  ;;  %2507 = vmatpush.bf16.msra.mxu3 %v3973_v9 }
 0x155   : > { %v1846_v33 = vpop.f32.mrf.mxu0  ;;  %v1821_v40 = vadd.f32 %v1820_v28, %v1808_v39 }
 0x156   : > { %2516 = vmatpush.bf16.msra.mxu1 %v3985_v10 }
 0x158   : > { %2508 = vmatpush.bf16.msra.mxu3 %v3972_v12 }
 0x159   : > { %v1833_v32 = vpop.f32.mrf.mxu2 }
 0x15a   : > { %v1834_v57 = vadd.f32 %v1833_v32, %v1821_v40  ;;  %2517 = vmatpush.bf16.msra.mxu1 %v3984_v55 }
 0x15c   : > { %v1822_v51 = vpop.f32.mrf.mxu3  ;;  %v1847_v43 = vadd.f32 %v1846_v33, %v1834_v57 }
 0x15d   : > { %v1848_v42 = vpop.f32.mrf.mxu0 }
 0x15e   : > { %2518 = vmatpush.bf16.msra.mxu1 %v3983_v13 }
 0x161   : > { %v1835_v41 = vpop.f32.mrf.mxu2 }
 0x162   : > { %2519 = vmatpush.bf16.msra.mxu1 %v3982_v16 }
 0x166   : > { %2520 = vmatpush.bf16.msra.mxu1 %v3981_v17 }
 0x169   : > { %v1859_v44 = vpop.f32.mrf.mxu2 }
 0x16a   : > { %v1860_v27 = vadd.f32 %v1859_v44, %v1847_v43  ;;  %2521 = vmatpush.bf16.msra.mxu1 %v3980_v45 }
 0x16c   : > { %v1866_v46 = vmax.f32 %v1860_v27, 0.0 }
 0x16e   : > { %v1870_v30 = vpack.c.bf16 %v1866_v46, %v1866_v46 }
 0x170   : > { %2308 = vmatmul.bf16.vlgmr.msra.gmra.mxu0 %v1870_v30 }
 0x171   : > { %v1861_v47 = vpop.f32.mrf.mxu2 }
 0x174   : > { %v2270_v48 = vpop.f32.mrf.mxu3 }
 0x175   : > { %v2271_v54 = vadd.f32 %v2270_v48, %v1937_v53 }
 0x17c   : > { %v2272_v50 = vpop.f32.mrf.mxu3 }
 0x17f   : > { %v2283_v56 = vpop.f32.mrf.mxu1 }
 0x180   : > { %2360 = vmatmul.bf16.vlgmr.msrb.gmra.mxu0 %v1870_v30  ;;  %v2284_v4 = vadd.f32 %v2283_v56, %v2271_v54 }
 0x187   : > { %v2285_v59 = vpop.f32.mrf.mxu1 }
 0x18f   : > { %v2335_v62 = vpop.f32.mrf.mxu1 }
 0x194   : > { %v2322_v58 = vpop.f32.mrf.mxu3 }
 0x195   : > { %v2323_v38 = vadd.f32 %v2322_v58, %v1938_v60 }
 0x197   : > { %v2336_v35 = vadd.f32 %v2335_v62, %v2323_v38  ;;  %v2337_v63 = vpop.f32.mrf.mxu1 }
 0x19c   : > { %v2324_v61 = vpop.f32.mrf.mxu3 }
 0x1c0   : > { %v2296_v7 = vpop.f32.mrf.mxu2 }
 0x1c1   : > { %v2297_v19 = vadd.f32 %v2296_v7, %v2284_v4 }
 0x1c8   : > { %v2298_v11 = vpop.f32.mrf.mxu2 }
 0x1d0   : > { %v2348_v15 = vpop.f32.mrf.mxu2 }
 0x1d1   : > { %v2349_v25 = vadd.f32 %v2348_v15, %v2336_v35 }
 0x1d8   : > { %v2350_v18 = vpop.f32.mrf.mxu2 }
 0x1ed   : > { %v2309_v20 = vpop.f32.mrf.mxu0 }
 0x1ee   : > { %v2310_v21 = vadd.f32 %v2309_v20, %v2297_v19 }
 0x1f0   : > { %v2365_v22 = vmax.f32 %v2310_v21, 0.0 }
 0x1f2   : > { %v2367_v23 = vpack.c.bf16 %v2365_v22, %v2365_v22 }
 0x1f4   : > { %2509 = vmatmul.bf16.vlgmr.msra.gmra.mxu3 %v2367_v23 }
 0x1f5   : > { %v2311_v24 = vpop.f32.mrf.mxu0 }
 0x1fd   : > { %v2361_v26 = vpop.f32.mrf.mxu0 }
 0x1fe   : > { %v2362_v28 = vadd.f32 %v2361_v26, %v2349_v25 }
 0x200   : > { %v2366_v29 = vmax.f32 %v2362_v28, 0.0 }
 0x202   : > { %v2368_v31 = vpack.c.bf16 %v2366_v29, %v2366_v29 }
 0x204   : > { %2522 = vmatmul.bf16.vlgmr.msra.gmra.mxu1 %v2368_v31 }
 0x205   : > { %v2363_v32 = vpop.f32.mrf.mxu0 }
 0x277   : > { %v2510_v33 = vpop.f32.mrf.mxu3 }
 0x278   : > { %v2511_v36 = vadd.f32 %v4010_v49, %v2510_v33 }
 0x27f   : > { %v2512_v34 = vpop.f32.mrf.mxu3 }
 0x281   : > { %v2523_v14 = vpop.f32.mrf.mxu1 }
 0x282   : > { %v2524_v39 = vadd.f32 %v2523_v14, %v2511_v36 }
 0x284   : > { %2527 = vst [vmem:[%s293_s17] sm:$0xff] %v2524_v39 }
 0x289   : > { %v2525_v51 = vpop.f32.mrf.mxu1 }
 0x28a PF: > { %s18_s24 = sadd.s32 1, %s4051_s24  }
 0x28b   : > { %p15_p7 = scmp.ge.s32.totalorder %s18_s24, 6  }
 0x28d   :  { %17 = sbr.rel (!%p15_p7) target bundleno = 1 (0x1), region = 83 }
 0x292   :  { %2547 = vsyncpa [#allocation3], 1 }
 0x293   :  { %2549 = vsyncpa [#allocation3 + $0x1], 1 }

</bundles_post_ra>
